<compile_context>
chip_gen: v5e
topology: v5e:2x2
jax: 0.10.0
libtpu: 0.0.40
codegen_flags: <defaults>
</compile_context>

<pallas_src>
import jax
import jax.numpy as jnp
from jax import lax
from jax.experimental import pallas as pl
from jax.experimental.pallas import tpu as pltpu


def _self_attn_kernel(x_ref, wq_ref, bq_ref, wk_ref, bk_ref, wv_ref, bv_ref,
                      gamma_ref, out_ref, attn_ref):
    # x_ref:   [T*C, N]        (t-major stacking of channels on the sublane axis)
    # wq/wk:   [T*Cq, T*C]     block-diagonal projections (kron(I_T, W))
    # wv:      [T*C,  T*C]
    # biases:  pre-broadcast to [rows, N] host-side (no lane-broadcast in-kernel)
    x = x_ref[...]                       # loaded once; reused for projections + residual

    # ---- fused 1x1x1 conv projections: one MXU matmul each (no per-t loop) ----
    q = jnp.dot(wq_ref[...], x, preferred_element_type=jnp.float32) + bq_ref[...]
    k = jnp.dot(wk_ref[...], x, preferred_element_type=jnp.float32) + bk_ref[...]
    v = jnp.dot(wv_ref[...], x, preferred_element_type=jnp.float32) + bv_ref[...]

    # ---- energy[n, m] = sum_p q[p, n] * k[p, m]: single stacked contraction,
    #      no live [N, N] running accumulator across an unrolled loop ----
    energy = lax.dot_general(q, k, (((0,), (0,)), ((), ())),
                             preferred_element_type=jnp.float32)        # [N, N]

    # ---- softmax over last dim (matches nn.Softmax(dim=-1)); row-sum
    #      reciprocal on the EUP instead of N*N VPU divides ----
    row_max = jnp.max(energy, axis=-1, keepdims=True)
    e = jnp.exp(energy - row_max)
    inv = pl.reciprocal(jnp.sum(e, axis=-1, keepdims=True), approx=False)
    attn = e * inv
    attn_ref[...] = attn

    # ---- out = V @ attn^T (bf16 MXU operands, f32 accumulation), then
    #      gamma * out + x ----
    ot = lax.dot_general(v.astype(jnp.bfloat16), attn.astype(jnp.bfloat16),
                         (((1,), (1,)), ((), ())),
                         preferred_element_type=jnp.float32)            # [T*C, N]
    out_ref[...] = gamma_ref[0, 0] * ot + x

    # TODO(synk): for N >= 1024 (v7x 64 MiB VMEM), tile the softmax/output over
    # query-row blocks (flash-style) instead of materializing the full [N, N].


def self_attention_for_hw(x, params):
    """x: [B, C, T, W, H] float32 (PyTorch NCTHW-ordered). Returns (out, attention)."""
    wq, bq, wk, bk, wv, bv, gamma = params
    B, C, T, W, H = x.shape
    N = W * H
    Cq = C // 8

    # ---- host-side layout glue ----
    # [B, C, T, W, H] -> [B, T, C, N] -> [B, T*C, N]  (t-major channel stacking)
    x_k = x.reshape(B, C, T, N).transpose(0, 2, 1, 3).reshape(B, T * C, N)

    # Block-diagonal weights: all T frames projected by a single matmul each.
    eye_t = jnp.eye(T, dtype=jnp.float32)
    wq_bd = jnp.kron(eye_t, wq)          # [T*Cq, T*C]
    wk_bd = jnp.kron(eye_t, wk)          # [T*Cq, T*C]
    wv_bd = jnp.kron(eye_t, wv)          # [T*C,  T*C]

    # Biases pre-broadcast to [rows, N] so the in-kernel add is a plain VPU add.
    bq_b = jnp.broadcast_to(jnp.tile(bq, T)[:, None], (T * Cq, N)).astype(jnp.float32)
    bk_b = jnp.broadcast_to(jnp.tile(bk, T)[:, None], (T * Cq, N)).astype(jnp.float32)
    bv_b = jnp.broadcast_to(jnp.tile(bv, T)[:, None], (T * C, N)).astype(jnp.float32)
    g2 = gamma.reshape(1, 1).astype(jnp.float32)

    out_k, attn = pl.pallas_call(
        _self_attn_kernel,
        out_shape=(jax.ShapeDtypeStruct((B, T * C, N), jnp.float32),
                   jax.ShapeDtypeStruct((B, N, N), jnp.float32)),
        grid=(B,),
        in_specs=[
            pl.BlockSpec((None, T * C, N), lambda b: (b, 0, 0)),   # x (stacked)
            pl.BlockSpec((T * Cq, T * C), lambda b: (0, 0)),       # Wq (block-diag)
            pl.BlockSpec((T * Cq, N), lambda b: (0, 0)),           # bq (broadcast)
            pl.BlockSpec((T * Cq, T * C), lambda b: (0, 0)),       # Wk (block-diag)
            pl.BlockSpec((T * Cq, N), lambda b: (0, 0)),           # bk (broadcast)
            pl.BlockSpec((T * C, T * C), lambda b: (0, 0)),        # Wv (block-diag)
            pl.BlockSpec((T * C, N), lambda b: (0, 0)),            # bv (broadcast)
            pl.BlockSpec((1, 1), lambda b: (0, 0)),                # gamma
        ],
        out_specs=(
            pl.BlockSpec((None, T * C, N), lambda b: (b, 0, 0)),
            pl.BlockSpec((None, N, N), lambda b: (b, 0, 0)),
        ),
        compiler_params=pltpu.CompilerParams(
            dimension_semantics=("parallel",),          # batch across TCs on v7x
            vmem_limit_bytes=32 * 1024 * 1024),
    )(x_k, wq_bd, bq_b, wk_bd, bk_b, wv_bd, bv_b, g2)

    # [B, T*C, N] -> [B, C, T, W, H]
    out = out_k.reshape(B, T, C, N).transpose(0, 2, 1, 3).reshape(B, C, T, W, H)
    return out, attn


def _reference(x, params):
    """Pure-JAX reference mirroring the PyTorch forward exactly (f32)."""
    wq, bq, wk, bk, wv, bv, gamma = params
    B, C, T, W, H = x.shape
    N = W * H

    def conv1x1x1(w, b):
        return jnp.einsum('oc,bcthw->bothw', w, x) + b[None, :, None, None, None]

    q = conv1x1x1(wq, bq).reshape(B, -1, N)      # [B, (C//8)*T, N]
    k = conv1x1x1(wk, bk).reshape(B, -1, N)      # [B, (C//8)*T, N]
    v = conv1x1x1(wv, bv).reshape(B, -1, N)      # [B, C*T, N]
    energy = jnp.einsum('bkn,bkm->bnm', q, k)    # [B, N, N]
    attn = jax.nn.softmax(energy, axis=-1)
    out = jnp.einsum('bkm,bnm->bkn', v, attn).reshape(B, C, T, W, H)
    out = gamma * out + x
    return out, attn


if __name__ == "__main__":
    key = jax.random.PRNGKey(0)
    B, C, T, W, H = 2, 16, 4, 16, 16
    Cq = C // 8
    ks = jax.random.split(key, 7)

    x = jax.random.normal(ks[0], (B, C, T, W, H), jnp.float32)
    # Conv3d(k=1) weights are [out, in, 1, 1, 1] in torch; stored here as [out, in].
    wq = jax.random.normal(ks[1], (Cq, C), jnp.float32) * 0.1
    bq = jax.random.normal(ks[2], (Cq,), jnp.float32) * 0.1
    wk = jax.random.normal(ks[3], (Cq, C), jnp.float32) * 0.1
    bk = jax.random.normal(ks[4], (Cq,), jnp.float32) * 0.1
    wv = jax.random.normal(ks[5], (C, C), jnp.float32) * 0.1
    bv = jax.random.normal(ks[6], (C,), jnp.float32) * 0.1
    # Module __init__ uses torch.zeros(1); use a nonzero value so the attention /
    # residual path is actually exercised by the check.
    gamma = jnp.array([0.5], jnp.float32)
    params = (wq, bq, wk, bk, wv, bv, gamma)

    out, attn = self_attention_for_hw(x, params)
    jax.block_until_ready((out, attn))

    out_ref, attn_ref = _reference(x, params)
    assert out.shape == (B, C, T, W, H) and attn.shape == (B, W * H, W * H)
    # attention path is full f32 -> tight tolerance; output matmul uses bf16 MXU
    # operands (f32 accumulation) -> slightly looser tolerance on `out`.
    assert jnp.allclose(attn, attn_ref, atol=1e-4, rtol=1e-4)
    assert jnp.allclose(out, out_ref, atol=2e-2, rtol=2e-2)
    print("KERNEL_OK")
</pallas_src>

<mosaic_0001>
module attributes {stable_mosaic.version = 11 : i64} {
  func.func @_self_attn_kernel(%arg0: i32, %arg1: memref<1x64x256xf32, #tpu.memory_space<vmem>>, %arg2: memref<8x64xf32, #tpu.memory_space<vmem>>, %arg3: memref<8x256xf32, #tpu.memory_space<vmem>>, %arg4: memref<8x64xf32, #tpu.memory_space<vmem>>, %arg5: memref<8x256xf32, #tpu.memory_space<vmem>>, %arg6: memref<64x64xf32, #tpu.memory_space<vmem>>, %arg7: memref<64x256xf32, #tpu.memory_space<vmem>>, %arg8: memref<1x1xf32, #tpu.memory_space<vmem>>, %arg9: memref<1x64x256xf32, #tpu.memory_space<vmem>>, %arg10: memref<1x256x256xf32, #tpu.memory_space<vmem>>) attributes {dimension_semantics = [#tpu.dimension_semantics<parallel>], iteration_bounds = array<i64: 2>, scalar_prefetch = 0 : i64, scratch_operands = 0 : i64, tpu.core_type = #tpu.core_type<tc>, window_params = [{transform_indices = @transform_0, window_bounds = array<i64: 1, 64, 256>}, {pipeline_mode = #tpu.pipeline_mode<synchronous>, transform_indices = @transform_1, window_bounds = array<i64: 8, 64>}, {pipeline_mode = #tpu.pipeline_mode<synchronous>, transform_indices = @transform_2, window_bounds = array<i64: 8, 256>}, {pipeline_mode = #tpu.pipeline_mode<synchronous>, transform_indices = @transform_3, window_bounds = array<i64: 8, 64>}, {pipeline_mode = #tpu.pipeline_mode<synchronous>, transform_indices = @transform_4, window_bounds = array<i64: 8, 256>}, {pipeline_mode = #tpu.pipeline_mode<synchronous>, transform_indices = @transform_5, window_bounds = array<i64: 64, 64>}, {pipeline_mode = #tpu.pipeline_mode<synchronous>, transform_indices = @transform_6, window_bounds = array<i64: 64, 256>}, {pipeline_mode = #tpu.pipeline_mode<synchronous>, transform_indices = @transform_7, window_bounds = array<i64: 1, 1>}, {transform_indices = @transform_8, window_bounds = array<i64: 1, 64, 256>}, {transform_indices = @transform_9, window_bounds = array<i64: 1, 256, 256>}]} {
    %c0 = arith.constant 0 : index
    %c0_0 = arith.constant 0 : index
    %c0_1 = arith.constant 0 : index
    %0 = vector.load %arg1[%c0, %c0_0, %c0_1] : memref<1x64x256xf32, #tpu.memory_space<vmem>>, vector<1x64x256xf32>
    %1 = vector.shape_cast %0 : vector<1x64x256xf32> to vector<64x256xf32>
    %c0_2 = arith.constant 0 : index
    %c0_3 = arith.constant 0 : index
    %2 = vector.load %arg2[%c0_2, %c0_3] : memref<8x64xf32, #tpu.memory_space<vmem>>, vector<8x64xf32>
    %cst = arith.constant dense<0.000000e+00> : vector<8x256xf32>
    %3 = tpu.matmul %2, %1, %cst {dimension_numbers = #tpu.dot_dimension_numbers<[1], [0], [0], [1], [0, 0, 1, 1], [], []>} : vector<8x64xf32>, vector<64x256xf32>, vector<8x256xf32> -> vector<8x256xf32>
    %c0_4 = arith.constant 0 : index
    %c0_5 = arith.constant 0 : index
    %4 = vector.load %arg3[%c0_4, %c0_5] : memref<8x256xf32, #tpu.memory_space<vmem>>, vector<8x256xf32>
    %5 = arith.addf %3, %4 : vector<8x256xf32>
    %c0_6 = arith.constant 0 : index
    %c0_7 = arith.constant 0 : index
    %6 = vector.load %arg4[%c0_6, %c0_7] : memref<8x64xf32, #tpu.memory_space<vmem>>, vector<8x64xf32>
    %cst_8 = arith.constant dense<0.000000e+00> : vector<8x256xf32>
    %7 = tpu.matmul %6, %1, %cst_8 {dimension_numbers = #tpu.dot_dimension_numbers<[1], [0], [0], [1], [0, 0, 1, 1], [], []>} : vector<8x64xf32>, vector<64x256xf32>, vector<8x256xf32> -> vector<8x256xf32>
    %c0_9 = arith.constant 0 : index
    %c0_10 = arith.constant 0 : index
    %8 = vector.load %arg5[%c0_9, %c0_10] : memref<8x256xf32, #tpu.memory_space<vmem>>, vector<8x256xf32>
    %9 = arith.addf %7, %8 : vector<8x256xf32>
    %c0_11 = arith.constant 0 : index
    %c0_12 = arith.constant 0 : index
    %10 = vector.load %arg6[%c0_11, %c0_12] : memref<64x64xf32, #tpu.memory_space<vmem>>, vector<64x64xf32>
    %cst_13 = arith.constant dense<0.000000e+00> : vector<64x256xf32>
    %11 = tpu.matmul %10, %1, %cst_13 {dimension_numbers = #tpu.dot_dimension_numbers<[1], [0], [0], [1], [0, 0, 1, 1], [], []>} : vector<64x64xf32>, vector<64x256xf32>, vector<64x256xf32> -> vector<64x256xf32>
    %c0_14 = arith.constant 0 : index
    %c0_15 = arith.constant 0 : index
    %12 = vector.load %arg7[%c0_14, %c0_15] : memref<64x256xf32, #tpu.memory_space<vmem>>, vector<64x256xf32>
    %13 = arith.addf %11, %12 : vector<64x256xf32>
    %cst_16 = arith.constant dense<0.000000e+00> : vector<256x256xf32>
    %14 = tpu.matmul %5, %9, %cst_16 {dimension_numbers = #tpu.dot_dimension_numbers<[0], [0], [1], [1], [0, 1, 1, 1], [], []>} : vector<8x256xf32>, vector<8x256xf32>, vector<256x256xf32> -> vector<256x256xf32>
    %cst_17 = arith.constant dense<0xFF800000> : vector<256xf32>
    %15 = vector.multi_reduction <maximumf>, %14, %cst_17 [1] : vector<256x256xf32> to vector<256xf32>
    %16 = vector.shape_cast %15 : vector<256xf32> to vector<256x1xf32>
    %17 = vector.broadcast %16 : vector<256x1xf32> to vector<256x256xf32>
    %18 = arith.subf %14, %17 : vector<256x256xf32>
    %19 = math.exp %18 : vector<256x256xf32>
    %cst_18 = arith.constant dense<0.000000e+00> : vector<256xf32>
    %20 = vector.multi_reduction <add>, %19, %cst_18 [1] : vector<256x256xf32> to vector<256xf32>
    %21 = vector.shape_cast %20 : vector<256xf32> to vector<256x1xf32>
    %22 = tpu.reciprocal %21 : vector<256x1xf32> -> vector<256x1xf32>
    %23 = vector.broadcast %22 : vector<256x1xf32> to vector<256x256xf32>
    %24 = arith.mulf %19, %23 : vector<256x256xf32>
    %c0_19 = arith.constant 0 : index
    %c0_20 = arith.constant 0 : index
    %c0_21 = arith.constant 0 : index
    %25 = vector.load %arg10[%c0_19, %c0_20, %c0_21] : memref<1x256x256xf32, #tpu.memory_space<vmem>>, vector<1x256x256xf32>
    %26 = vector.shape_cast %25 : vector<1x256x256xf32> to vector<256x256xf32>
    %27 = vector.shape_cast %24 : vector<256x256xf32> to vector<1x256x256xf32>
    tpu.vector_store %arg10[%c0_19, %c0_20, %c0_21], %27 {strides = array<i32>} : memref<1x256x256xf32, #tpu.memory_space<vmem>>, vector<1x256x256xf32>,
    %28 = arith.truncf %13 : vector<64x256xf32> to vector<64x256xbf16>
    %29 = arith.truncf %24 : vector<256x256xf32> to vector<256x256xbf16>
    %cst_22 = arith.constant dense<0.000000e+00> : vector<64x256xf32>
    %30 = tpu.matmul %28, %29, %cst_22 {dimension_numbers = #tpu.dot_dimension_numbers<[1], [1], [0], [0], [0, 0, 1, 0], [], []>} : vector<64x256xbf16>, vector<256x256xbf16>, vector<64x256xf32> -> vector<64x256xf32>
    %c0_23 = arith.constant 0 : index
    %c0_24 = arith.constant 0 : index
    %31 = vector.load %arg8[%c0_23, %c0_24] : memref<1x1xf32, #tpu.memory_space<vmem>>, vector<1x1xf32>
    %32 = vector.extract %31[0, 0] : f32 from vector<1x1xf32>
    %33 = vector.broadcast %32 : f32 to vector<64x256xf32>
    %34 = arith.mulf %33, %30 : vector<64x256xf32>
    %35 = arith.addf %34, %1 : vector<64x256xf32>
    %c0_25 = arith.constant 0 : index
    %c0_26 = arith.constant 0 : index
    %c0_27 = arith.constant 0 : index
    %36 = vector.load %arg9[%c0_25, %c0_26, %c0_27] : memref<1x64x256xf32, #tpu.memory_space<vmem>>, vector<1x64x256xf32>
    %37 = vector.shape_cast %36 : vector<1x64x256xf32> to vector<64x256xf32>
    %38 = vector.shape_cast %35 : vector<64x256xf32> to vector<1x64x256xf32>
    tpu.vector_store %arg9[%c0_25, %c0_26, %c0_27], %38 {strides = array<i32>} : memref<1x64x256xf32, #tpu.memory_space<vmem>>, vector<1x64x256xf32>,
    return
  }
  func.func @transform_0(%arg0: i32) -> (i32, i32, i32) {
    %c0_i32 = arith.constant 0 : i32
    %c0_i32_0 = arith.constant 0 : i32
    %c0_i32_1 = arith.constant 0 : i32
    return %arg0, %c0_i32, %c0_i32_0 : i32, i32, i32
  }
  func.func @transform_1(%arg0: i32) -> (i32, i32) {
    %c0_i32 = arith.constant 0 : i32
    %c0_i32_0 = arith.constant 0 : i32
    %c0_i32_1 = arith.constant 0 : i32
    return %c0_i32, %c0_i32_0 : i32, i32
  }
  func.func @transform_2(%arg0: i32) -> (i32, i32) {
    %c0_i32 = arith.constant 0 : i32
    %c0_i32_0 = arith.constant 0 : i32
    %c0_i32_1 = arith.constant 0 : i32
    return %c0_i32, %c0_i32_0 : i32, i32
  }
  func.func @transform_3(%arg0: i32) -> (i32, i32) {
    %c0_i32 = arith.constant 0 : i32
    %c0_i32_0 = arith.constant 0 : i32
    %c0_i32_1 = arith.constant 0 : i32
    return %c0_i32, %c0_i32_0 : i32, i32
  }
  func.func @transform_4(%arg0: i32) -> (i32, i32) {
    %c0_i32 = arith.constant 0 : i32
    %c0_i32_0 = arith.constant 0 : i32
    %c0_i32_1 = arith.constant 0 : i32
    return %c0_i32, %c0_i32_0 : i32, i32
  }
  func.func @transform_5(%arg0: i32) -> (i32, i32) {
    %c0_i32 = arith.constant 0 : i32
    %c0_i32_0 = arith.constant 0 : i32
    %c0_i32_1 = arith.constant 0 : i32
    return %c0_i32, %c0_i32_0 : i32, i32
  }
  func.func @transform_6(%arg0: i32) -> (i32, i32) {
    %c0_i32 = arith.constant 0 : i32
    %c0_i32_0 = arith.constant 0 : i32
    %c0_i32_1 = arith.constant 0 : i32
    return %c0_i32, %c0_i32_0 : i32, i32
  }
  func.func @transform_7(%arg0: i32) -> (i32, i32) {
    %c0_i32 = arith.constant 0 : i32
    %c0_i32_0 = arith.constant 0 : i32
    %c0_i32_1 = arith.constant 0 : i32
    return %c0_i32, %c0_i32_0 : i32, i32
  }
  func.func @transform_8(%arg0: i32) -> (i32, i32, i32) {
    %c0_i32 = arith.constant 0 : i32
    %c0_i32_0 = arith.constant 0 : i32
    %c0_i32_1 = arith.constant 0 : i32
    return %arg0, %c0_i32, %c0_i32_0 : i32, i32, i32
  }
  func.func @transform_9(%arg0: i32) -> (i32, i32, i32) {
    %c0_i32 = arith.constant 0 : i32
    %c0_i32_0 = arith.constant 0 : i32
    %c0_i32_1 = arith.constant 0 : i32
    return %arg0, %c0_i32, %c0_i32_0 : i32, i32, i32
  }
}

</mosaic_0001>

<bundles_post_ra>
// kernel: tpu_custom_call.1
= control target key start
LH: loop header
LB: loop body
LE: loop exit
PB: predicated region body
PF: predicated region fallthrough
CT: control target
= control target key end

     0   :  { %s4891_s0 = inlined_call_operand.hbm [shape: f32[2,64,256], index: 0, kind: input, shape index: {}]   ;;  %s4892_s1 = inlined_call_operand.hbm [shape: f32[8,64], index: 1, kind: input, shape index: {}]   ;;  %s4893_s2 = inlined_call_operand.hbm [shape: f32[8,256], index: 2, kind: input, shape index: {}]   ;;  %s4894_s3 = inlined_call_operand.hbm [shape: f32[8,64], index: 3, kind: input, shape index: {}]   ;;  %s4895_s4 = inlined_call_operand.hbm [shape: f32[8,256], index: 4, kind: input, shape index: {}]   ;;  %s4896_s5 = inlined_call_operand.hbm [shape: f32[64,64], index: 5, kind: input, shape index: {}]   ;;  %s4897_s6 = inlined_call_operand.hbm [shape: f32[64,256], index: 6, kind: input, shape index: {}]   ;;  %s4898_s7 = inlined_call_operand.<no memory space> [shape: f32[1,1], index: 7, kind: input, shape index: {}]   ;;  %s4899_s8 = inlined_call_operand.hbm [shape: f32[2,64,256], index: 8, kind: output, shape index: {0}]   ;;  %s4900_s9 = inlined_call_operand.hbm [shape: f32[2,256,256], index: 9, kind: output, shape index: {1}]  }
   0x1   :  { %4934 = sst [smem:[#allocation48_spill]] %s4892_s1  ;;  %v15_v0 = vstv %s4898_s7 }
   0x2   :  { %4935 = sst [smem:[#allocation49_spill]] %s4893_s2  ;;  %16 = vst [vmem:[#allocation2] sm:$0x1] %v15_v0 }
   0x3   :  { %4936 = sst [smem:[#allocation50_spill]] %s4894_s3 }
   0x4   :  { %17 = vsyncpa [#allocation4], 0 }
   0x5   :  { %19 = vsyncpa [#allocation4 + $0x1], 0 }
   0x6   :  { %20 = vsyncpa [#allocation7], 0 }
   0x7   :  { %21 = vsyncpa [#allocation10], 0 }
   0x8   :  { %22 = vsyncpa [#allocation13], 0 }
   0x9   :  { %23 = vsyncpa [#allocation5], 0 }
   0xa   :  { %25 = vsyncpa [#allocation5 + $0x1], 0 }
   0xb   :  { %26 = vsyncpa [#allocation17], 0 }
   0xc   :  { %28 = vsyncpa [#allocation17 + $0x1], 0  ;;  %s3286_s11 = smov 0   ;;  %s3288_s12 = smov 0  }
   0xd   :  { %s3290_s13 = smov 0   ;;  %s3292_s14 = smov 0  }
   0xe LB: > { %s4937_s1 = sld [smem:[#allocation48_spill]]  ;;  %s3310_s17 = sadd.s32 4294967295, %s3219_s14   ;;  %s3219_s14 = sphi %s3292_s14, %s5073_s14   ;;  %s3215_s13 = sphi %s3290_s13, %s5072_s13   ;;  %s3211_s12 = sphi %s3288_s12, %s5071_s12   ;;  %s3207_s11 = sphi %s3286_s11, %s5070_s11  }
   0xf   : > { %p2452_p0 = scmp.ge.s32.totalorder %s3219_s14, 1  ;;  %p55_p1 = scmp.eq.s32.totalorder %s3310_s17, 0 }
  0x10   : > { %p264_p2 = scmp.lt.s32.totalorder %s3219_s14, 3  ;;  %s3221_s19 = smov [#allocation6]  }
  0x11   : > { %s278_s20 = sshll.u32 %s3221_s19, 4  ;;  %s4939_s3 = sld [smem:[#allocation50_spill]]  ;;  %s279_s20 = int_to_ptr.vmem [resolvable:$true] %s278_s20 }
  0x12   : > { %p3315_p3 = pnand %p2452_p0, %p264_p2  ;;  %s3222_s25 = smov [#allocation9]  }
  0x13   : > { %s302_s26 = sshll.u32 %s3222_s25, 4  ;;  %s323_s29 = sshll.u32 %s4896_s5, 4  ;;  %s303_s26 = int_to_ptr.vmem [resolvable:$true] %s302_s26  ;;  %s324_s29 = int_to_ptr.hbm [resolvable:$true] %s323_s29 }
  0x14   : > { %s276_s16 = sshll.u32 %s4937_s1, 4  ;;  %p2600_p5 = pneg %p3315_p3  ;;  %s277_s16 = int_to_ptr.hbm [resolvable:$true] %s276_s16 }
  0x15   : > { %s3223_s30 = smov [#allocation12]   ;;  %s4941_s2 = sld [smem:[#allocation49_spill]] }
  0x16   : > { %p3327_p6 = pnand %p2600_p5, %p55_p1  ;;  %s325_s10 = sshll.u32 %s3223_s30, 4  ;;  %s326_s10 = int_to_ptr.vmem [resolvable:$true] %s325_s10 }
  0x17   : > { %s300_s23 = sshll.u32 %s4939_s3, 4  ;;  %s3224_s21 = smov 128   ;;  %s301_s23 = int_to_ptr.hbm [resolvable:$true] %s300_s23 }
  0x18   : > { %2603 = dma.hbm_to_vmem [thread:$0]  (!%p3327_p6), %s277_s16, 128, %s279_s20, [#allocation7]  }
  0x19   : > { %2609 = dma.hbm_to_vmem [thread:$0]  (!%p3327_p6), %s301_s23, 128, %s303_s26, [#allocation10]  }
  0x1a   : > { %s3225_s22 = smov 8   ;;  %s3226_s25 = smov [#allocation8]  }
  0x1b   : > { %s288_s19 = sshll.u32 %s4941_s2, 4  ;;  %s290_s27 = sshll.u32 %s3226_s25, 4  ;;  %s289_s19 = int_to_ptr.hbm [resolvable:$true] %s288_s19  ;;  %s291_s27 = int_to_ptr.vmem [resolvable:$true] %s290_s27 }
  0x1c   : > { %2615 = dma.hbm_to_vmem [thread:$0]  (!%p3327_p6), %s324_s29, 1024, %s326_s10, [#allocation13], %s3224_s21, %s3224_s21, %s3225_s22  }
  0x1d   : > { %s312_s16 = sshll.u32 %s4895_s4, 4  ;;  %s337_s26 = sshll.u32 %s4897_s6, 4  ;;  %s313_s16 = int_to_ptr.hbm [resolvable:$true] %s312_s16  ;;  %s338_s26 = int_to_ptr.hbm [resolvable:$true] %s337_s26 }
  0x1e   : > { %2606 = dma.hbm_to_vmem [thread:$0]  (!%p3327_p6), %s289_s19, 256, %s291_s27, [#allocation7]  }
  0x1f   : > { %s3227_s29 = smov [#allocation11]   ;;  %s3228_s1 = smov [#allocation14]  }
  0x20   : > { %s314_s30 = sshll.u32 %s3227_s29, 4  ;;  %s339_s10 = sshll.u32 %s3228_s1, 4  ;;  %s315_s30 = int_to_ptr.vmem [resolvable:$true] %s314_s30  ;;  %s340_s10 = int_to_ptr.vmem [resolvable:$true] %s339_s10 }
  0x21   : > { %2612 = dma.hbm_to_vmem [thread:$0]  (!%p3327_p6), %s313_s16, 256, %s315_s30, [#allocation10]  }
  0x22   : > { %s4901_s7 = smov 256   ;;  %s4902_s15 = smov 16  }
  0x23   : > { %2618 = dma.hbm_to_vmem [thread:$0]  (!%p3327_p6), %s338_s26, 2048, %s340_s10, [#allocation13], %s4901_s7, %s4901_s7, %s4902_s15  }
  0x24   : > { %s2451_s19 = sadd.s32 4294967294, %s3219_s14   ;;  %s3360_s21 = sadd.s32 1, %s3219_s14  }
  0x25   : > { %s38_s22 = ssub.s32 %s3219_s14, %s3360_s21  ;;  %s41_s25 = sadd.s32 1, %s3215_s13 }
  0x26   : > { %p39_p7 = scmp.eq.s32.totalorder %s38_s22, 0  ;;  %p48_p8 = scmp.ne.s32.totalorder %s3215_s13, %s3211_s12 }
  0x27   : > { %p49_p9 = scmp.eq.s32.totalorder %s3219_s14, 0  ;;  %p54_p10 = scmp.ne.s32.totalorder %s3211_s12, %s3207_s11 }
  0x28   : > { %s3371_s27 = scalar_select %p39_p7, %s3215_s13, %s41_s25  }
  0x29   : > { %p3373_p11 = por %p49_p9, %p48_p8  ;;  %p3379_p12 = por %p55_p1, %p54_p10 }
  0x2a   : > { %p225_p13 = scmp.eq.s32.totalorder %s3310_s17, 1  ;;  %p231_p0 = scmp.eq.s32.totalorder %s2451_s19, 1 }
  0x2b   : > { %p2636_p2 = scmp.lt.s32.totalorder %s3219_s14, 2  ;;  %s356_s16 = sand.u32 1, %s3215_s13  }
  0x2c   : > { %p3386_p5 = por %p225_p13, %p48_p8  ;;  %p3390_p6 = por %p231_p0, %p54_p10 }
  0x2d   : > { %s2460_s26 = sshll.u32 %s356_s16, 7  ;;  %s2565_s29 = sshll.u32 %s3219_s14, 7 }
  0x2e   : > { %s365_s10 = scalar_lea.hbm %s4891_s0, %s2565_s29  ;;  %s360_s22 = scalar_lea.vmem [#allocation3], %s2460_s26 }
  0x2f   : > { %s368_s25 = sshll.u32 %s360_s22, 4  ;;  %s366_s7 = sshll.u32 %s365_s10, 4  ;;  %s369_s25 = int_to_ptr.vmem [resolvable:$true] %s368_s25  ;;  %s367_s7 = int_to_ptr.hbm [resolvable:$true] %s366_s7 }
  0x30   : > { %p3400_p7 = pnand %p2636_p2, %p3373_p11  ;;  %s357_s15 = scalar_lea.sflag [#allocation4], %s356_s16 }
  0x31   : > { %s3079_s2 = sshra.s32 %s367_s7, 4  ;;  %s3086_s30 = scalar_lea.hbm %s4891_s0, 256  ;;  %s3080_s2 = int_to_ptr.hbm [resolvable:$true] %s3079_s2 }
  0x32   : > { %s3081_s3 = scalar_lea.hbm %s3080_s2, 128  ;;  %p3083_p9 = pneg %p3400_p7 }
  0x33   : > { %p3082_p8 = scmp.ne.s32.totalorder %s3080_s2, %s3081_s3  ;;  %p3087_p11 = scmp.lt.s32.totalorder %s3080_s2, %s4891_s0 }
  0x34   : > { %p3088_p0 = scmp.lt.s32.totalorder %s3086_s30, %s3081_s3 }
  0x35   : > { %p3084_p10 = pnand %p3083_p9, %p3082_p8 }
  0x36   : > { %p3089_p2 = por %p3088_p0, %p3087_p11 }
  0x37   : > { %p3085_p13 = pneg %p3084_p10 }
  0x39   : > { %p3090_p4 = pnand %p3089_p2, %p3085_p13 }
  0x3b   : > { %3093 = shalt.err (!%p3090_p4)
}
  0x3c   : > { %s4947_s16 = smov 16   ;;  %s4948_s10 = smov 256  }
  0x3d   : > { %2622 = dma.hbm_to_vmem [thread:$0]  (!%p3400_p7), %s367_s7, 2048, %s369_s25, %s357_s15, %s4948_s10, %s4948_s10, %s4947_s16  }
  0x3e   : > { %380 = sbr.rel (%p3315_p3) target bundleno = 1299 (0x513), region = 52 }
  0x43   : > { %s3420_s22 = sand.u32 1, %s3211_s12  }
  0x44   : > { %s2464_s2 = sshll.u32 %s3420_s22, 7  ;;  %s383_s3 = scalar_lea.sflag [#allocation4], %s3420_s22 }
  0x45   : > { %s3426_s26 = scalar_lea.vmem [#allocation3], %s2464_s2 }
  0x46   : > { %3182 = dma.done.wait (%p3379_p12), %s383_s3, 2048  }
  0x47   : > { %3184 = vsyncadd (%p3379_p12), %s383_s3, 4294965248 }
  0x48   : > { %3186 = dma.done.wait (%p55_p1), [#allocation7], 384  }
  0x49   : > { %3188 = vsyncadd (%p55_p1), [#allocation7], 4294966912 }
  0x4a   : > { %3190 = dma.done.wait (%p55_p1), [#allocation10], 384  }
  0x4b   : > { %3192 = vsyncadd (%p55_p1), [#allocation10], 4294966912 }
  0x4c   : > { %3194 = dma.done.wait (%p55_p1), [#allocation13], 3072  }
  0x4d   : > { %3196 = vsyncadd (%p55_p1), [#allocation13], 4294964224  ;;  %v471_v1 = vld [vmem:[%s3426_s26 + $0x70] sm:$0xff]  ;;  %v469_v2 = vld [vmem:[%s3426_s26 + $0x60] sm:$0xff]  ;;  %vm476_vm0 = vcmask 523264   ;;  %vm760_vm1 = vcmask 64512  }
  0x4e   : > { %488 = vmatpush.msra.mxu0 %v471_v1  ;;  %v467_v3 = vld [vmem:[%s3426_s26 + $0x50] sm:$0xff]  ;;  %v472_v4 = vld [vmem:[%s3426_s26 + $0x78] sm:$0xff]  ;;  %v470_v5 = vld [vmem:[%s3426_s26 + $0x68] sm:$0xff]  ;;  %s2472_s18 = sshll.u32 %s3420_s22, 9  ;;  %s4785_s28 = scalar_lea.vmem [#allocation15], %s2464_s2 }
  0x4f   : > { %v465_v6 = vld [vmem:[%s3426_s26 + $0x40] sm:$0xff]  ;;  %508 = vmatpush.msra.mxu1 %v472_v4  ;;  %v468_v7 = vld [vmem:[%s3426_s26 + $0x58] sm:$0xff]  ;;  %v463_v8 = vld [vmem:[%s3426_s26 + $0x30] sm:$0xff]  ;;  %s3865_s7 = scalar_lea.vmem [#allocation16], %s2472_s18  ;;  %s2567_s25 = sshll.u32 %s3310_s17, 9 }
  0x50   : > { %489 = vmatpush.msra.mxu0 %v469_v2  ;;  %v466_v9 = vld [vmem:[%s3426_s26 + $0x48] sm:$0xff]  ;;  %v461_v10 = vld [vmem:[%s3426_s26 + $0x20] sm:$0xff]  ;;  %v464_v11 = vld [vmem:[%s3426_s26 + $0x38] sm:$0xff]  ;;  %s2285_s19 = sshll.u32 %s3865_s7, 4  ;;  %s2284_s1 = scalar_lea.hbm %s4900_s9, %s2567_s25  ;;  %s2286_s19 = int_to_ptr.vmem [resolvable:$true] %s2285_s19 }
  0x51   : > { %509 = vmatpush.msra.mxu1 %v470_v5  ;;  %v459_v12 = vld [vmem:[%s3426_s26 + $0x10] sm:$0xff]  ;;  %v462_v13 = vld [vmem:[%s3426_s26 + $0x28] sm:$0xff]  ;;  %v457_v14 = vld [vmem:[%s3426_s26] sm:$0xff]  ;;  %s2287_s24 = sshll.u32 %s2284_s1, 4  ;;  %s2256_s16 = scalar_lea.sflag [#allocation17], %s3420_s22  ;;  %s2288_s24 = int_to_ptr.hbm [resolvable:$true] %s2287_s24 }
  0x52   : > { %490 = vmatpush.msra.mxu0 %v467_v3  ;;  %v473_v15 = vld [vmem:[#allocation6] sm:$0xff]  ;;  %v460_v16 = vld [vmem:[%s3426_s26 + $0x18] sm:$0xff]  ;;  %v458_v17 = vld [vmem:[%s3426_s26 + $0x8] sm:$0xff]  ;;  %s3123_s10 = sshra.s32 %s2288_s24, 4  ;;  %s3124_s10 = int_to_ptr.hbm [resolvable:$true] %s3123_s10 }
  0x53   : > { %510 = vmatpush.msra.mxu1 %v468_v7  ;;  %v520_v18 = vld [vmem:[#allocation9] sm:$0xff]  ;;  %v474_v19 = vld [vmem:[#allocation8] sm:$0xff]  ;;  %v521_v23 = vld [vmem:[#allocation11] sm:$0xff]  ;;  %s3125_s2 = scalar_lea.hbm %s3124_s10, 512  ;;  %p3130_p12 = scmp.lt.s32.totalorder %s3124_s10, %s4900_s9 }
  0x54   : > { %491 = vmatpush.msra.mxu0 %v465_v6  ;;  %v522_v26 = vld [vmem:[#allocation11 + $0x8] sm:$0xff]  ;;  %v475_v29 = vld [vmem:[#allocation8 + $0x8] sm:$0xff]  ;;  %p3126_p1 = scmp.ne.s32.totalorder %s3124_s10, %s3125_s2 }
  0x55   : > { %511 = vmatpush.msra.mxu1 %v466_v9 }
  0x56   : > { %492 = vmatpush.msra.mxu0 %v463_v8  ;;  %p3127_p3 = pnand %p3126_p1, %p3386_p5 }
  0x57   : > { %512 = vmatpush.msra.mxu1 %v464_v11 }
  0x58   : > { %493 = vmatpush.msra.mxu0 %v461_v10  ;;  %p3128_p4 = pneg %p3127_p3 }
  0x59   : > { %513 = vmatpush.msra.mxu1 %v462_v13 }
  0x5a   : > { %494 = vmatpush.msra.mxu0 %v459_v12 }
  0x5b   : > { %514 = vmatpush.msra.mxu1 %v460_v16 }
  0x5c   : > { %495 = vmatpush.msra.mxu0 %v457_v14 }
  0x5d   : > { %2473 = vmatmul.msk.f32.vlgmr.msra.gmra.mxu0 %vm476_vm0, %v473_v15  ;;  %515 = vmatpush.msra.mxu1 %v458_v17 }
  0x5e   : > { %534 = vmatpush.msrb.mxu0 %v471_v1  ;;  %2474 = vmatmul.msk.f32.vlgmr.msra.gmra.mxu1 %vm476_vm0, %v473_v15 }
  0x5f   : > { %554 = vmatpush.msrb.mxu1 %v472_v4 }
  0x60   : > { %535 = vmatpush.msrb.mxu0 %v469_v2 }
  0x61   : > { %555 = vmatpush.msrb.mxu1 %v470_v5 }
  0x62   : > { %536 = vmatpush.msrb.mxu0 %v467_v3 }
  0x63   : > { %556 = vmatpush.msrb.mxu1 %v468_v7 }
  0x64   : > { %537 = vmatpush.msrb.mxu0 %v465_v6 }
  0x65   : > { %557 = vmatpush.msrb.mxu1 %v466_v9 }
  0x66   : > { %538 = vmatpush.msrb.mxu0 %v463_v8 }
  0x67   : > { %558 = vmatpush.msrb.mxu1 %v464_v11 }
  0x68   : > { %539 = vmatpush.msrb.mxu0 %v461_v10 }
  0x69   : > { %559 = vmatpush.msrb.mxu1 %v462_v13 }
  0x6a   : > { %540 = vmatpush.msrb.mxu0 %v459_v12 }
  0x6b   : > { %560 = vmatpush.msrb.mxu1 %v460_v16 }
  0x6c   : > { %541 = vmatpush.msrb.mxu0 %v457_v14 }
  0x6d   : > { %2475 = vmatmul.msk.f32.vlgmr.msrb.gmra.mxu0 %vm476_vm0, %v520_v18  ;;  %561 = vmatpush.msrb.mxu1 %v458_v17 }
  0x6e   : > { %622 = vmatpush.msra.mxu0 %v471_v1  ;;  %2476 = vmatmul.msk.f32.vlgmr.msrb.gmra.mxu1 %vm476_vm0, %v520_v18 }
  0x6f   : > { %663 = vmatpush.msra.mxu1 %v472_v4 }
  0x70   : > { %623 = vmatpush.msra.mxu0 %v469_v2 }
  0x71   : > { %664 = vmatpush.msra.mxu1 %v470_v5 }
  0x72   : > { %624 = vmatpush.msra.mxu0 %v467_v3 }
  0x73   : > { %665 = vmatpush.msra.mxu1 %v468_v7 }
  0x74   : > { %625 = vmatpush.msra.mxu0 %v465_v6 }
  0x75   : > { %666 = vmatpush.msra.mxu1 %v466_v9 }
  0x76   : > { %626 = vmatpush.msra.mxu0 %v463_v8 }
  0x77   : > { %667 = vmatpush.msra.mxu1 %v464_v11 }
  0x78   : > { %627 = vmatpush.msra.mxu0 %v461_v10 }
  0x79   : > { %668 = vmatpush.msra.mxu1 %v462_v13 }
  0x7a   : > { %628 = vmatpush.msra.mxu0 %v459_v12 }
  0x7b   : > { %669 = vmatpush.msra.mxu1 %v460_v16 }
  0x7c   : > { %629 = vmatpush.msra.mxu0 %v457_v14 }
  0x7d   : > { %670 = vmatpush.msra.mxu1 %v458_v17 }
  0xda   : > { %v497_v20 = vpop.f32.mrf.mxu0 }
  0xdb   : > { %v498_v21 = vadd.f32 %v497_v20, %v474_v19  ;;  %v517_v25 = vpop.f32.mrf.mxu1 }
  0xdc   : > { %v518_v30 = vadd.f32 %v517_v25, %v475_v29 }
  0xdd   : > { %696 = vxpose.xlu0.b32.start.end [1/1] (short) %v498_v21, 128 }
  0xea   : > { %v543_v22 = vpop.f32.mrf.mxu0 }
  0xeb   : > { %v544_v24 = vadd.f32 %v543_v22, %v521_v23  ;;  %v563_v27 = vpop.f32.mrf.mxu1 }
  0xec   : > { %v564_v28 = vadd.f32 %v563_v27, %v522_v26 }
  0xed   : > { %872 = vmatpush.msra.mxu2 %v544_v24 }
  0xee   : > { %985 = vmatpush.msra.mxu3 %v564_v28 }
 0x15d   : > { %728 = vxpose.xlu0.b32.start.end [1/1] (short) %v518_v30, 128 }
 0x181   : > { %v712_v31 = vpop.trf.xlu0 }
 0x182   : > { %2493 = vmatmul.msk.f32.vlgmr.msra.gmra.mxu2 %vm760_vm1, %v712_v31  ;;  %2525 = vmatmul.msk.f32.vlgmr.msra.gmra.mxu3 %vm760_vm1, %v712_v31 }
 0x189   : > { %v713_v32 = vpop.trf.xlu0 }
 0x18a   : > { %2494 = vmatmul.msk.f32.gmra.mxu2 %vm760_vm1, %v713_v32  ;;  %2526 = vmatmul.msk.f32.gmra.mxu3 %vm760_vm1, %v713_v32 }
 0x191   : > { %v714_v33 = vpop.trf.xlu0 }
 0x192   : > { %2495 = vmatmul.msk.f32.gmra.mxu2 %vm760_vm1, %v714_v33  ;;  %2527 = vmatmul.msk.f32.gmra.mxu3 %vm760_vm1, %v714_v33 }
 0x199   : > { %v715_v34 = vpop.trf.xlu0 }
 0x19a   : > { %2496 = vmatmul.msk.f32.gmra.mxu2 %vm760_vm1, %v715_v34  ;;  %2528 = vmatmul.msk.f32.gmra.mxu3 %vm760_vm1, %v715_v34 }
 0x1a1   : > { %v716_v35 = vpop.trf.xlu0 }
 0x1a2   : > { %2497 = vmatmul.msk.f32.gmra.mxu2 %vm760_vm1, %v716_v35  ;;  %2529 = vmatmul.msk.f32.gmra.mxu3 %vm760_vm1, %v716_v35 }
 0x1a9   : > { %v717_v36 = vpop.trf.xlu0 }
 0x1aa   : > { %2498 = vmatmul.msk.f32.gmra.mxu2 %vm760_vm1, %v717_v36  ;;  %2530 = vmatmul.msk.f32.gmra.mxu3 %vm760_vm1, %v717_v36 }
 0x1b1   : > { %v718_v37 = vpop.trf.xlu0 }
 0x1b2   : > { %2499 = vmatmul.msk.f32.gmra.mxu2 %vm760_vm1, %v718_v37  ;;  %2531 = vmatmul.msk.f32.gmra.mxu3 %vm760_vm1, %v718_v37 }
 0x1b9   : > { %v719_v38 = vpop.trf.xlu0 }
 0x1ba   : > { %2500 = vmatmul.msk.f32.gmra.mxu2 %vm760_vm1, %v719_v38  ;;  %2532 = vmatmul.msk.f32.gmra.mxu3 %vm760_vm1, %v719_v38 }
 0x1c1   : > { %v720_v39 = vpop.trf.xlu0 }
 0x1c2   : > { %2501 = vmatmul.msk.f32.gmra.mxu2 %vm760_vm1, %v720_v39  ;;  %2533 = vmatmul.msk.f32.gmra.mxu3 %vm760_vm1, %v720_v39 }
 0x1c9   : > { %v721_v40 = vpop.trf.xlu0 }
 0x1ca   : > { %2502 = vmatmul.msk.f32.gmra.mxu2 %vm760_vm1, %v721_v40  ;;  %2534 = vmatmul.msk.f32.gmra.mxu3 %vm760_vm1, %v721_v40 }
 0x1d1   : > { %v722_v41 = vpop.trf.xlu0 }
 0x1d2   : > { %2503 = vmatmul.msk.f32.gmra.mxu2 %vm760_vm1, %v722_v41  ;;  %2535 = vmatmul.msk.f32.gmra.mxu3 %vm760_vm1, %v722_v41 }
 0x1d9   : > { %v723_v42 = vpop.trf.xlu0 }
 0x1da   : > { %2504 = vmatmul.msk.f32.gmra.mxu2 %vm760_vm1, %v723_v42  ;;  %2536 = vmatmul.msk.f32.gmra.mxu3 %vm760_vm1, %v723_v42 }
 0x1e1   : > { %v724_v43 = vpop.trf.xlu0 }
 0x1e2   : > { %2505 = vmatmul.msk.f32.gmra.mxu2 %vm760_vm1, %v724_v43  ;;  %2537 = vmatmul.msk.f32.gmra.mxu3 %vm760_vm1, %v724_v43 }
 0x1e9   : > { %v725_v44 = vpop.trf.xlu0 }
 0x1ea   : > { %2506 = vmatmul.msk.f32.gmra.mxu2 %vm760_vm1, %v725_v44  ;;  %2538 = vmatmul.msk.f32.gmra.mxu3 %vm760_vm1, %v725_v44 }
 0x1f1   : > { %v726_v45 = vpop.trf.xlu0 }
 0x1f2   : > { %2507 = vmatmul.msk.f32.gmra.mxu2 %vm760_vm1, %v726_v45  ;;  %2539 = vmatmul.msk.f32.gmra.mxu3 %vm760_vm1, %v726_v45 }
 0x1f9   : > { %v727_v46 = vpop.trf.xlu0 }
 0x1fa   : > { %2508 = vmatmul.msk.f32.gmra.mxu2 %vm760_vm1, %v727_v46  ;;  %2540 = vmatmul.msk.f32.gmra.mxu3 %vm760_vm1, %v727_v46 }
 0x201   : > { %v744_v47 = vpop.trf.xlu0 }
 0x202   : > { %2509 = vmatmul.msk.f32.gmra.mxu2 %vm760_vm1, %v744_v47  ;;  %2541 = vmatmul.msk.f32.gmra.mxu3 %vm760_vm1, %v744_v47 }
 0x205   : > { %v3498_v48 = vpop.f32.mrf.mxu2  ;;  %v3500_v49 = vpop.f32.mrf.mxu3 }
 0x206   : > { %v1083_v50 = vmax.f32 %v3498_v48, %v3500_v49 }
 0x208   : > { %1084 = vmax.xlane.f32.xlu1 %v1083_v50 }
 0x209   : > { %v745_v51 = vpop.trf.xlu0 }
 0x20a   : > { %2510 = vmatmul.msk.f32.gmra.mxu2 %vm760_vm1, %v745_v51  ;;  %2542 = vmatmul.msk.f32.gmra.mxu3 %vm760_vm1, %v745_v51 }
 0x20d   : > { %v3506_v52 = vpop.f32.mrf.mxu2  ;;  %v3508_v53 = vpop.f32.mrf.mxu3 }
 0x20e   : > { %v1086_v54 = vmax.f32 %v3506_v52, %v3508_v53 }
 0x210   : > { %1087 = vmax.xlane.f32.xlu2 %v1086_v54 }
 0x211   : > { %v746_v55 = vpop.trf.xlu0 }
 0x212   : > { %2511 = vmatmul.msk.f32.gmra.mxu2 %vm760_vm1, %v746_v55  ;;  %2543 = vmatmul.msk.f32.gmra.mxu3 %vm760_vm1, %v746_v55 }
 0x215   : > { %v3514_v56 = vpop.f32.mrf.mxu2  ;;  %v3516_v57 = vpop.f32.mrf.mxu3 }
 0x216   : > { %v1089_v58 = vmax.f32 %v3514_v56, %v3516_v57 }
 0x218   : > { %1090 = vmax.xlane.f32.xlu1 %v1089_v58 }
 0x219   : > { %v747_v59 = vpop.trf.xlu0 }
 0x21a   : > { %2512 = vmatmul.msk.f32.gmra.mxu2 %vm760_vm1, %v747_v59  ;;  %2544 = vmatmul.msk.f32.gmra.mxu3 %vm760_vm1, %v747_v59 }
 0x21d   : > { %v3522_v60 = vpop.f32.mrf.mxu2  ;;  %v3524_v61 = vpop.f32.mrf.mxu3 }
 0x21e   : > { %v1092_v62 = vmax.f32 %v3522_v60, %v3524_v61 }
 0x220   : > { %1093 = vmax.xlane.f32.xlu2 %v1092_v62 }
 0x221   : > { %v748_v63 = vpop.trf.xlu0 }
 0x222   : > { %2513 = vmatmul.msk.f32.gmra.mxu2 %vm760_vm1, %v748_v63  ;;  %2545 = vmatmul.msk.f32.gmra.mxu3 %vm760_vm1, %v748_v63 }
 0x225   : > { %v3530_v0 = vpop.f32.mrf.mxu2  ;;  %v3532_v1 = vpop.f32.mrf.mxu3 }
 0x226   : > { %v1095_v2 = vmax.f32 %v3530_v0, %v3532_v1 }
 0x228   : > { %1096 = vmax.xlane.f32.xlu1 %v1095_v2 }
 0x229   : > { %v749_v3 = vpop.trf.xlu0 }
 0x22a   : > { %2514 = vmatmul.msk.f32.gmra.mxu2 %vm760_vm1, %v749_v3  ;;  %2546 = vmatmul.msk.f32.gmra.mxu3 %vm760_vm1, %v749_v3 }
 0x22d   : > { %v3538_v4 = vpop.f32.mrf.mxu2  ;;  %v3540_v5 = vpop.f32.mrf.mxu3 }
 0x22e   : > { %v1098_v6 = vmax.f32 %v3538_v4, %v3540_v5 }
 0x230   : > { %1099 = vmax.xlane.f32.xlu2 %v1098_v6 }
 0x231   : > { %v750_v7 = vpop.trf.xlu0 }
 0x232   : > { %2515 = vmatmul.msk.f32.gmra.mxu2 %vm760_vm1, %v750_v7  ;;  %2547 = vmatmul.msk.f32.gmra.mxu3 %vm760_vm1, %v750_v7 }
 0x235   : > { %v3546_v8 = vpop.f32.mrf.mxu2  ;;  %v3548_v9 = vpop.f32.mrf.mxu3 }
 0x236   : > { %v1101_v10 = vmax.f32 %v3546_v8, %v3548_v9 }
 0x238   : > { %1102 = vmax.xlane.f32.xlu1 %v1101_v10 }
 0x239   : > { %v751_v11 = vpop.trf.xlu0 }
 0x23a   : > { %2516 = vmatmul.msk.f32.gmra.mxu2 %vm760_vm1, %v751_v11  ;;  %2548 = vmatmul.msk.f32.gmra.mxu3 %vm760_vm1, %v751_v11 }
 0x23d   : > { %v3554_v12 = vpop.f32.mrf.mxu2  ;;  %v3556_v13 = vpop.f32.mrf.mxu3 }
 0x23e   : > { %v1104_v14 = vmax.f32 %v3554_v12, %v3556_v13 }
 0x240   : > { %1105 = vmax.xlane.f32.xlu2 %v1104_v14 }
 0x241   : > { %v752_v15 = vpop.trf.xlu0 }
 0x242   : > { %2517 = vmatmul.msk.f32.gmra.mxu2 %vm760_vm1, %v752_v15  ;;  %2549 = vmatmul.msk.f32.gmra.mxu3 %vm760_vm1, %v752_v15 }
 0x245   : > { %v3562_v16 = vpop.f32.mrf.mxu2  ;;  %v3564_v17 = vpop.f32.mrf.mxu3 }
 0x246   : > { %v1107_v18 = vmax.f32 %v3562_v16, %v3564_v17 }
 0x248   : > { %1108 = vmax.xlane.f32.xlu1 %v1107_v18 }
 0x249   : > { %v753_v19 = vpop.trf.xlu0 }
 0x24a   : > { %2518 = vmatmul.msk.f32.gmra.mxu2 %vm760_vm1, %v753_v19  ;;  %2550 = vmatmul.msk.f32.gmra.mxu3 %vm760_vm1, %v753_v19 }
 0x24d   : > { %v3570_v20 = vpop.f32.mrf.mxu2  ;;  %v3572_v21 = vpop.f32.mrf.mxu3 }
 0x24e   : > { %v1110_v22 = vmax.f32 %v3570_v20, %v3572_v21 }
 0x250   : > { %1111 = vmax.xlane.f32.xlu2 %v1110_v22 }
 0x251   : > { %v754_v23 = vpop.trf.xlu0 }
 0x252   : > { %2519 = vmatmul.msk.f32.gmra.mxu2 %vm760_vm1, %v754_v23  ;;  %2551 = vmatmul.msk.f32.gmra.mxu3 %vm760_vm1, %v754_v23 }
 0x255   : > { %v3578_v24 = vpop.f32.mrf.mxu2  ;;  %v3580_v25 = vpop.f32.mrf.mxu3 }
 0x256   : > { %v1113_v26 = vmax.f32 %v3578_v24, %v3580_v25 }
 0x258   : > { %1114 = vmax.xlane.f32.xlu1 %v1113_v26 }
 0x259   : > { %v755_v27 = vpop.trf.xlu0 }
 0x25a   : > { %2520 = vmatmul.msk.f32.gmra.mxu2 %vm760_vm1, %v755_v27  ;;  %2552 = vmatmul.msk.f32.gmra.mxu3 %vm760_vm1, %v755_v27 }
 0x25d   : > { %v3586_v28 = vpop.f32.mrf.mxu2  ;;  %v3588_v29 = vpop.f32.mrf.mxu3 }
 0x25e   : > { %v1116_v30 = vmax.f32 %v3586_v28, %v3588_v29 }
 0x260   : > { %1117 = vmax.xlane.f32.xlu2 %v1116_v30 }
 0x261   : > { %v756_v31 = vpop.trf.xlu0 }
 0x262   : > { %2521 = vmatmul.msk.f32.gmra.mxu2 %vm760_vm1, %v756_v31  ;;  %2553 = vmatmul.msk.f32.gmra.mxu3 %vm760_vm1, %v756_v31 }
 0x265   : > { %v3594_v32 = vpop.f32.mrf.mxu2  ;;  %v3596_v33 = vpop.f32.mrf.mxu3 }
 0x266   : > { %v1119_v34 = vmax.f32 %v3594_v32, %v3596_v33 }
 0x268   : > { %1120 = vmax.xlane.f32.xlu2 %v1119_v34 }
 0x269   : > { %v757_v35 = vpop.trf.xlu0 }
 0x26a   : > { %2522 = vmatmul.msk.f32.gmra.mxu2 %vm760_vm1, %v757_v35  ;;  %2554 = vmatmul.msk.f32.gmra.mxu3 %vm760_vm1, %v757_v35 }
 0x26d   : > { %v3602_v36 = vpop.f32.mrf.mxu2  ;;  %v3604_v37 = vpop.f32.mrf.mxu3 }
 0x26e   : > { %v1122_v38 = vmax.f32 %v3602_v36, %v3604_v37 }
 0x270   : > { %1123 = vmax.xlane.f32.xlu2 %v1122_v38 }
 0x271   : > { %v758_v39 = vpop.trf.xlu0 }
 0x272   : > { %2523 = vmatmul.msk.f32.gmra.mxu2 %vm760_vm1, %v758_v39  ;;  %2555 = vmatmul.msk.f32.gmra.mxu3 %vm760_vm1, %v758_v39 }
 0x275   : > { %v3610_v40 = vpop.f32.mrf.mxu2  ;;  %v3612_v41 = vpop.f32.mrf.mxu3 }
 0x276   : > { %v1125_v42 = vmax.f32 %v3610_v40, %v3612_v41 }
 0x278   : > { %1126 = vmax.xlane.f32.xlu1 %v1125_v42 }
 0x279   : > { %v759_v43 = vpop.trf.xlu0 }
 0x27a   : > { %2524 = vmatmul.msk.f32.gmra.mxu2 %vm760_vm1, %v759_v43  ;;  %2556 = vmatmul.msk.f32.gmra.mxu3 %vm760_vm1, %v759_v43 }
 0x27b   : > { %v3628_v51 = vpop.xlane.xlu1 %1084 }
 0x27d   : > { %v3618_v44 = vpop.f32.mrf.mxu2  ;;  %v3620_v45 = vpop.f32.mrf.mxu3 }
 0x27e   : > { %v1128_v46 = vmax.f32 %v3618_v44, %v3620_v45 }
 0x280   : > { %1129 = vmax.xlane.f32.xlu1 %v1128_v46 }
 0x283   : > { %v3640_v63 = vpop.xlane.xlu2 %1087 }
 0x285   : > { %v3624_v47 = vpop.f32.mrf.mxu2  ;;  %v3626_v50 = vpop.f32.mrf.mxu3 }
 0x286   : > { %4949 = vst [vmem:[#allocation24_spill] sm:$0xff] %v3624_v47 }
 0x287   : > { %4950 = vst [vmem:[#allocation25_spill] sm:$0xff] %v3626_v50 }
 0x28b   : > { %v3634_v58 = vpop.xlane.xlu1 %1090 }
 0x28d   : > { %v3630_v54 = vpop.f32.mrf.mxu2  ;;  %v3632_v55 = vpop.f32.mrf.mxu3 }
 0x293   : > { %v3648_v15 = vpop.xlane.xlu2 %1093 }
 0x295   : > { %v3636_v59 = vpop.f32.mrf.mxu2  ;;  %v3638_v62 = vpop.f32.mrf.mxu3 }
 0x296   : > { %4951 = vst [vmem:[#allocation26_spill] sm:$0xff] %v3636_v59 }
 0x297   : > { %4952 = vst [vmem:[#allocation27_spill] sm:$0xff] %v3638_v62 }
 0x29b   : > { %v1097_v2 = vpop.xlane.xlu1 %1096 }
 0x29c   : > { %v1187_v3 = vsub.f32 %v3530_v0, %v1097_v2  ;;  %v1188_v6 = vsub.f32 %v3532_v1, %v1097_v2 }
 0x29d   : > { %v3644_v7 = vpop.f32.mrf.mxu2  ;;  %v3646_v10 = vpop.f32.mrf.mxu3 }
 0x29e   : > { %v1259_v11 = vmul.f32 1.442695, %v1187_v3  ;;  %v1261_v14 = vmul.f32 1.442695, %v1188_v6 }
 0x2a0   : > { %2689 = vpow2.f32 %v1259_v11 }
 0x2a1   : > { %2691 = vpow2.f32 %v1261_v14 }
 0x2a3   : > { %v3660_v1 = vpop.xlane.xlu2 %1099 }
 0x2a5   : > { %v3650_v18 = vpop.f32.mrf.mxu2  ;;  %v3652_v19 = vpop.f32.mrf.mxu3 }
 0x2a6   : > { %v3654_v22 = vpop.eup %2689 }
 0x2a7   : > { %v3656_v23 = vpop.eup %2691 }
 0x2a8   : > { %v1383_v0 = vadd.f32 %v3656_v23, %v3654_v22 }
 0x2aa   : > { %1384 = vadd.xlane.f32.xlu0 %v1383_v0 }
 0x2ab   : > { %v1103_v26 = vpop.xlane.xlu1 %1102 }
 0x2ac   : > { %v1191_v27 = vsub.f32 %v3546_v8, %v1103_v26  ;;  %v1192_v30 = vsub.f32 %v3548_v9, %v1103_v26 }
 0x2ad   : > { %v3664_v31 = vpop.f32.mrf.mxu2  ;;  %v3666_v34 = vpop.f32.mrf.mxu3 }
 0x2ae   : > { %v1267_v35 = vmul.f32 1.442695, %v1191_v27  ;;  %v1269_v38 = vmul.f32 1.442695, %v1192_v30 }
 0x2b0   : > { %2693 = vpow2.f32 %v1267_v35 }
 0x2b1   : > { %2695 = vpow2.f32 %v1269_v38 }
 0x2b3   : > { %v1106_v39 = vpop.xlane.xlu2 %1105 }
 0x2b4   : > { %v1193_v42 = vsub.f32 %v3554_v12, %v1106_v39  ;;  %v1194_v43 = vsub.f32 %v3556_v13, %v1106_v39 }
 0x2b5   : > { %v3670_v46 = vpop.f32.mrf.mxu2  ;;  %v3672_v2 = vpop.f32.mrf.mxu3 }
 0x2b6   : > { %v3674_v8 = vpop.eup %2693  ;;  %v1271_v9 = vmul.f32 1.442695, %v1193_v42  ;;  %v1273_v3 = vmul.f32 1.442695, %v1194_v43 }
 0x2b7   : > { %v3676_v6 = vpop.eup %2695 }
 0x2b8   : > { %2697 = vpow2.f32 %v1271_v9  ;;  %v1389_v11 = vadd.f32 %v3676_v6, %v3674_v8 }
 0x2b9   : > { %2699 = vpow2.f32 %v1273_v3 }
 0x2ba   : > { %1390 = vadd.xlane.f32.xlu1 %v1389_v11 }
 0x2bb   : > { %v1109_v14 = vpop.xlane.xlu1 %1108 }
 0x2bc   : > { %v1195_v12 = vsub.f32 %v3562_v16, %v1109_v14  ;;  %v1196_v13 = vsub.f32 %v3564_v17, %v1109_v14 }
 0x2bd   : > { %v3682_v0 = vpop.f32.mrf.mxu2  ;;  %v3684_v26 = vpop.f32.mrf.mxu3 }
 0x2be   : > { %v3686_v27 = vpop.eup %2697  ;;  %v1275_v35 = vmul.f32 1.442695, %v1195_v12  ;;  %v1277_v39 = vmul.f32 1.442695, %v1196_v13 }
 0x2bf   : > { %v3688_v30 = vpop.eup %2699 }
 0x2c0   : > { %v1392_v38 = vadd.f32 %v3688_v30, %v3686_v27  ;;  %2701 = vpow2.f32 %v1275_v35 }
 0x2c1   : > { %2703 = vpow2.f32 %v1277_v39 }
 0x2c2   : > { %1393 = vadd.xlane.f32.xlu2 %v1392_v38 }
 0x2c3   : > { %v1112_v42 = vpop.xlane.xlu2 %1111 }
 0x2c4   : > { %v1197_v16 = vsub.f32 %v3570_v20, %v1112_v42  ;;  %v1198_v17 = vsub.f32 %v3572_v21, %v1112_v42 }
 0x2c5   : > { %v3694_v43 = vpop.f32.mrf.mxu2  ;;  %v3696_v9 = vpop.f32.mrf.mxu3 }
 0x2c6   : > { %4953 = vst [vmem:[#allocation28_spill] sm:$0xff] %v3694_v43  ;;  %v1279_v3 = vmul.f32 1.442695, %v1197_v16  ;;  %v1281_v11 = vmul.f32 1.442695, %v1198_v17  ;;  %v1155_v14 = vmax.f32 %v3694_v43, %v3696_v9  ;;  %v3700_v12 = vpop.eup %2701 }
 0x2c7   : > { %4954 = vst [vmem:[#allocation29_spill] sm:$0xff] %v3696_v9  ;;  %v3702_v13 = vpop.eup %2703 }
 0x2c8   : > { %2705 = vpow2.f32 %v1279_v3  ;;  %1156 = vmax.xlane.f32.xlu1 %v1155_v14  ;;  %4955 = vst [vmem:[#allocation30_spill] sm:$0xff] %v3702_v13  ;;  %v1395_v16 = vadd.f32 %v3702_v13, %v3700_v12 }
 0x2c9   : > { %2707 = vpow2.f32 %v1281_v11 }
 0x2cb   : > { %v1115_v20 = vpop.xlane.xlu1 %1114 }
 0x2cc   : > { %v1199_v21 = vsub.f32 %v3578_v24, %v1115_v20  ;;  %v1200_v35 = vsub.f32 %v3580_v25, %v1115_v20 }
 0x2cd   : > { %v3706_v38 = vpop.f32.mrf.mxu2  ;;  %v3708_v39 = vpop.f32.mrf.mxu3 }
 0x2ce   : > { %v3710_v42 = vpop.eup %2705  ;;  %v1283_v3 = vmul.f32 1.442695, %v1199_v21  ;;  %v1285_v14 = vmul.f32 1.442695, %v1200_v35 }
 0x2cf   : > { %v3714_v17 = vpop.eup %2707 }
 0x2d0   : > { %4956 = vst [vmem:[#allocation31_spill] sm:$0xff] %v3714_v17  ;;  %1396 = vadd.xlane.f32.xlu1 %v1395_v16  ;;  %v1398_v11 = vadd.f32 %v3714_v17, %v3710_v42  ;;  %2709 = vpow2.f32 %v1283_v3 }
 0x2d1   : > { %2711 = vpow2.f32 %v1285_v14 }
 0x2d2   : > { %1399 = vadd.xlane.f32.xlu2 %v1398_v11 }
 0x2d3   : > { %v1118_v24 = vpop.xlane.xlu2 %1117 }
 0x2d4   : > { %v1201_v25 = vsub.f32 %v3586_v28, %v1118_v24  ;;  %v1202_v20 = vsub.f32 %v3588_v29, %v1118_v24 }
 0x2d5   : > { %v3720_v9 = vpop.f32.mrf.mxu2  ;;  %v3722_v43 = vpop.f32.mrf.mxu3 }
 0x2d6   : > { %4957 = vst [vmem:[#allocation32_spill] sm:$0xff] %v3720_v9  ;;  %v1161_v21 = vmax.f32 %v3720_v9, %v3722_v43  ;;  %v1287_v16 = vmul.f32 1.442695, %v1201_v25  ;;  %v1289_v13 = vmul.f32 1.442695, %v1202_v20  ;;  %v3726_v17 = vpop.eup %2709 }
 0x2d7   : > { %4958 = vst [vmem:[#allocation33_spill] sm:$0xff] %v3722_v43  ;;  %v3728_v35 = vpop.eup %2711 }
 0x2d8   : > { %1162 = vmax.xlane.f32.xlu1 %v1161_v21  ;;  %2713 = vpow2.f32 %v1287_v16  ;;  %v1401_v24 = vadd.f32 %v3728_v35, %v3726_v17 }
 0x2d9   : > { %2715 = vpow2.f32 %v1289_v13 }
 0x2db   : > { %v1121_v3 = vpop.xlane.xlu2 %1120 }
 0x2dc   : > { %v1203_v28 = vsub.f32 %v3594_v32, %v1121_v3  ;;  %v1204_v29 = vsub.f32 %v3596_v33, %v1121_v3 }
 0x2dd   : > { %v3732_v11 = vpop.f32.mrf.mxu2  ;;  %v3734_v14 = vpop.f32.mrf.mxu3 }
 0x2de   : > { %4959 = vst [vmem:[#allocation34_spill] sm:$0xff] %v3732_v11  ;;  %v1164_v25 = vmax.f32 %v3732_v11, %v3734_v14  ;;  %v1291_v20 = vmul.f32 1.442695, %v1203_v28  ;;  %v1293_v21 = vmul.f32 1.442695, %v1204_v29  ;;  %v3740_v16 = vpop.eup %2713 }
 0x2df   : > { %4960 = vst [vmem:[#allocation35_spill] sm:$0xff] %v3734_v14  ;;  %v3742_v32 = vpop.eup %2715 }
 0x2e0   : > { %1402 = vadd.xlane.f32.xlu1 %v1401_v24  ;;  %1165 = vmax.xlane.f32.xlu2 %v1164_v25  ;;  %2717 = vpow2.f32 %v1291_v20  ;;  %v1404_v28 = vadd.f32 %v3742_v32, %v3740_v16 }
 0x2e1   : > { %2719 = vpow2.f32 %v1293_v21 }
 0x2e3   : > { %v1124_v13 = vpop.xlane.xlu2 %1123 }
 0x2e4   : > { %v1205_v33 = vsub.f32 %v3602_v36, %v1124_v13  ;;  %v1206_v3 = vsub.f32 %v3604_v37, %v1124_v13 }
 0x2e5   : > { %v3746_v43 = vpop.f32.mrf.mxu2  ;;  %v3748_v9 = vpop.f32.mrf.mxu3 }
 0x2e6   : > { %v1167_v29 = vmax.f32 %v3746_v43, %v3748_v9  ;;  %v1295_v24 = vmul.f32 1.442695, %v1205_v33  ;;  %v1297_v25 = vmul.f32 1.442695, %v1206_v3  ;;  %v3754_v20 = vpop.eup %2717 }
 0x2e7   : > { %4961 = vst [vmem:[#allocation36_spill] sm:$0xff] %v3754_v20  ;;  %v3756_v36 = vpop.eup %2719 }
 0x2e8   : > { %1405 = vadd.xlane.f32.xlu2 %v1404_v28  ;;  %1168 = vmax.xlane.f32.xlu1 %v1167_v29  ;;  %4962 = vst [vmem:[#allocation37_spill] sm:$0xff] %v3756_v36  ;;  %2721 = vpow2.f32 %v1295_v24  ;;  %v1407_v33 = vadd.f32 %v3756_v36, %v3754_v20 }
 0x2e9   : > { %2723 = vpow2.f32 %v1297_v25  ;;  %v1190_v25 = vsub.f32 %v3540_v5, %v3660_v1 }
 0x2eb   : > { %v1127_v21 = vpop.xlane.xlu1 %1126  ;;  %v1265_v20 = vmul.f32 1.442695, %v1190_v25 }
 0x2ec   : > { %v1207_v37 = vsub.f32 %v3610_v40, %v1127_v21  ;;  %v1208_v13 = vsub.f32 %v3612_v41, %v1127_v21  ;;  %v1189_v40 = vsub.f32 %v3538_v4, %v3660_v1 }
 0x2ed   : > { %v3760_v14 = vpop.f32.mrf.mxu2  ;;  %v3762_v11 = vpop.f32.mrf.mxu3 }
 0x2ee   : > { %4963 = vst [vmem:[#allocation38_spill] sm:$0xff] %v3762_v11  ;;  %v1170_v3 = vmax.f32 %v3760_v14, %v3762_v11  ;;  %v1299_v28 = vmul.f32 1.442695, %v1207_v37  ;;  %v1301_v29 = vmul.f32 1.442695, %v1208_v13  ;;  %v3768_v24 = vpop.eup %2721 }
 0x2ef   : > { %v3772_v41 = vpop.eup %2723 }
 0x2f0   : > { %1408 = vadd.xlane.f32.xlu1 %v1407_v33  ;;  %1171 = vmax.xlane.f32.xlu2 %v1170_v3  ;;  %2725 = vpow2.f32 %v1299_v28  ;;  %v1263_v3 = vmul.f32 1.442695, %v1189_v40  ;;  %v1410_v4 = vadd.f32 %v3772_v41, %v3768_v24 }
 0x2f1   : > { %2727 = vpow2.f32 %v1301_v29 }
 0x2f2   : > { %2729 = vpow2.f32 %v1263_v3  ;;  %v1186_v3 = vsub.f32 %v3524_v61, %v3648_v15  ;;  %v1152_v61 = vmax.f32 %v3682_v0, %v3684_v26 }
 0x2f3   : > { %v1130_v21 = vpop.xlane.xlu1 %1129  ;;  %2731 = vpow2.f32 %v1265_v20 }
 0x2f4   : > { %v1209_v36 = vsub.f32 %v3618_v44, %v1130_v21  ;;  %v1210_v37 = vsub.f32 %v3620_v45, %v1130_v21 }
 0x2f5   : > { %v3778_v33 = vpop.f32.mrf.mxu2  ;;  %v3780_v13 = vpop.f32.mrf.mxu3 }
 0x2f6   : > { %v1173_v11 = vmax.f32 %v3778_v33, %v3780_v13  ;;  %v1303_v5 = vmul.f32 1.442695, %v1209_v36  ;;  %v1305_v1 = vmul.f32 1.442695, %v1210_v37  ;;  %v3786_v44 = vpop.eup %2725  ;;  %v1185_v37 = vsub.f32 %v3522_v60, %v3648_v15 }
 0x2f7   : > { %v3788_v45 = vpop.eup %2727  ;;  %v1184_v60 = vsub.f32 %v3516_v57, %v3634_v58  ;;  %v1158_v15 = vmax.f32 %v3706_v38, %v3708_v39  ;;  %v1182_v57 = vsub.f32 %v3508_v53, %v3640_v63  ;;  %v1180_v53 = vsub.f32 %v3500_v49, %v3628_v51 }
 0x2f8   : > { %1411 = vadd.xlane.f32.xlu2 %v1410_v4  ;;  %1174 = vmax.xlane.f32.xlu1 %v1173_v11  ;;  %2733 = vpow2.f32 %v1303_v5  ;;  %v1413_v36 = vadd.f32 %v3788_v45, %v3786_v44  ;;  %v3798_v11 = vpop.eup %2729 }
 0x2f9   : > { %2735 = vpow2.f32 %v1305_v1  ;;  %v3800_v25 = vpop.eup %2731  ;;  %v1255_v1 = vmul.f32 1.442695, %v1185_v37  ;;  %v1253_v37 = vmul.f32 1.442695, %v1184_v60 }
 0x2fa   : > { %4964 = vst [vmem:[#allocation39_spill] sm:$0xff] %v3800_v25  ;;  %v1386_v4 = vadd.f32 %v3800_v25, %v3798_v11 }
 0x2fb   : > { %2737 = vpow2.f32 %v1255_v1 }
 0x2fd   : > { %v3790_v28 = vpop.f32.mrf.mxu2  ;;  %v3792_v29 = vpop.f32.mrf.mxu3 }
 0x2fe   : > { %v1176_v40 = vmax.f32 %v3790_v28, %v3792_v29  ;;  %v3802_v21 = vpop.eup %2733 }
 0x2ff   : > { %v3804_v20 = vpop.eup %2735 }
 0x300   : > { %1414 = vadd.xlane.f32.xlu1 %v1413_v36  ;;  %1177 = vmax.xlane.f32.xlu2 %v1176_v40  ;;  %v1416_v5 = vadd.f32 %v3804_v20, %v3802_v21  ;;  %v1257_v40 = vmul.f32 1.442695, %v1186_v3  ;;  %v1183_v36 = vsub.f32 %v3514_v56, %v3634_v58  ;;  %v1181_v56 = vsub.f32 %v3506_v52, %v3640_v63 }
 0x301   : > { %v1179_v52 = vsub.f32 %v3498_v48, %v3628_v51 }
 0x302   : > { %2739 = vpow2.f32 %v1257_v40  ;;  %v1251_v25 = vmul.f32 1.442695, %v1183_v36  ;;  %v1247_v1 = vmul.f32 1.442695, %v1181_v56  ;;  %v1249_v40 = vmul.f32 1.442695, %v1182_v57 }
 0x304   : > { %2741 = vpow2.f32 %v1251_v25  ;;  %v1146_v25 = vmax.f32 %v3664_v31, %v3666_v34 }
 0x305   : > { %2743 = vpow2.f32 %v1253_v37  ;;  %v1245_v37 = vmul.f32 1.442695, %v1180_v53 }
 0x306   : > { %2745 = vpow2.f32 %v1247_v1 }
 0x307   : > { %2747 = vpow2.f32 %v1249_v40 }
 0x308   : > { %1387 = vadd.xlane.f32.xlu1 %v1386_v4  ;;  %1417 = vadd.xlane.f32.xlu2 %v1416_v5  ;;  %v3822_v4 = vpop.eup %2737  ;;  %v1149_v5 = vmax.f32 %v3670_v46, %v3672_v2 }
 0x309   : > { %v3824_v3 = vpop.eup %2739 }
 0x30a   : > { %v1380_v58 = vadd.f32 %v3824_v3, %v3822_v4  ;;  %v3834_v36 = vpop.eup %2741 }
 0x30b   : > { %v3836_v60 = vpop.eup %2743 }
 0x30c   : > { %v3846_v56 = vpop.eup %2745 }
 0x30d   : > { %4965 = vst [vmem:[#allocation40_spill] sm:$0xff] %v3846_v56  ;;  %v3848_v48 = vpop.eup %2747 }
 0x30e   : > { %4966 = vst [vmem:[#allocation41_spill] sm:$0xff] %v3848_v48  ;;  %v1374_v51 = vadd.f32 %v3848_v48, %v3846_v56 }
 0x310   : > { %1153 = vmax.xlane.f32.xlu1 %v1152_v61  ;;  %1159 = vmax.xlane.f32.xlu2 %v1158_v15  ;;  %v1377_v61 = vadd.f32 %v3836_v60, %v3834_v36  ;;  %v1243_v15 = vmul.f32 1.442695, %v1179_v52 }
 0x318   : > { %1381 = vadd.xlane.f32.xlu1 %v1380_v58  ;;  %1150 = vmax.xlane.f32.xlu2 %v1149_v5  ;;  %v1143_v58 = vmax.f32 %v3650_v18, %v3652_v19 }
 0x31d   : > { %v1385_v63 = vpop.xlane.xlu0 %1384 }
 0x31e   : > { %2749 = vrcp.f32 %v1385_v63  ;;  %v1534_v40 = vand.u32 2147483648, %v1385_v63  ;;  %v1532_v53 = vand.u32 2147483647, %v1385_v63  ;;  %vm1528_vm3 = vweird.f32 %v1385_v63 }
 0x31f   : > { %2751 = vpow2.f32 %v1243_v15 }
 0x320   : > { %1147 = vmax.xlane.f32.xlu1 %v1146_v25  ;;  %1378 = vadd.xlane.f32.xlu2 %v1377_v61  ;;  %2753 = vpow2.f32 %v1245_v37  ;;  %v1535_v37 = vor.u32 1.1754944e-38, %v1534_v40  ;;  %vm1533_vm5 = vcmp.eq.f32.partialorder %v1532_v53, 8.507059e+37  ;;  %v1134_v53 = vmax.f32 %v3630_v54, %v3632_v55 }
 0x324   : > { %v2750_v57 = vpop.eup %2749 }
 0x325   : > { %v1524_v49 = vmul.f32 %v2750_v57, %v1385_v63  ;;  %vm1529_vm2 = vweird.f32 %v2750_v57  ;;  %v3854_v52 = vpop.eup %2751 }
 0x326   : > { %4967 = vst [vmem:[#allocation42_spill] sm:$0xff] %v3854_v52  ;;  %v3856_v25 = vpop.eup %2753  ;;  %vm1530_vm4 = vmor %vm1528_vm3, %vm1529_vm2 }
 0x327   : > { %v1525_v5 = vsub.f32 1.0, %v1524_v49  ;;  %4968 = vst [vmem:[#allocation43_spill] sm:$0xff] %v3856_v25  ;;  %v1140_v49 = vmax.f32 %v3644_v7, %v3646_v10 }
 0x328   : > { %1375 = vadd.xlane.f32.xlu1 %v1374_v51  ;;  %1144 = vmax.xlane.f32.xlu2 %v1143_v58  ;;  %v1371_v51 = vadd.f32 %v3856_v25, %v3854_v52 }
 0x329   : > { %v1526_v1 = vmul.f32 %v2750_v57, %v1525_v5 }
 0x32b   : > { %v1527_v61 = vadd.f32 %v2750_v57, %v1526_v1 }
 0x32d   : > { %v1531_v15 = vsel %vm1530_vm4, %v2750_v57, %v1527_v61  ;;  %v1391_v48 = vpop.xlane.xlu1 %1390  ;;  %v1137_v61 = vmax.f32 %v3636_v59, %v3638_v62 }
 0x32e   : > { %2755 = vrcp.f32 %v1391_v48  ;;  %v1536_v58 = vsel %vm1533_vm5, %v1535_v37, %v1531_v15  ;;  %v1560_v37 = vand.u32 2147483647, %v1391_v48  ;;  %vm1556_vm7 = vweird.f32 %v1391_v48 }
 0x32f   : > { %v1923_v5 = vmul.f32 %v3654_v22, %v1536_v58  ;;  %v1924_v63 = vmul.f32 %v3656_v23, %v1536_v58  ;;  %v1562_v22 = vand.u32 2147483648, %v1391_v48 }
 0x330   : > { %1141 = vmax.xlane.f32.xlu1 %v1140_v49  ;;  %1372 = vadd.xlane.f32.xlu2 %v1371_v51  ;;  %vm1561_vm9 = vcmp.eq.f32.partialorder %v1560_v37, 8.507059e+37 }
 0x331   : > { %1987 = vst [vmem:[%s3865_s7 + $0x40] sm:$0xff] %v1923_v5  ;;  %v1563_v5 = vor.u32 1.1754944e-38, %v1562_v22 }
 0x332   : > { %1988 = vst [vmem:[%s3865_s7 + $0x48] sm:$0xff] %v1924_v63 }
 0x334   : > { %v2756_v57 = vpop.eup %2755 }
 0x335   : > { %v1552_v1 = vmul.f32 %v2756_v57, %v1391_v48  ;;  %v1394_v40 = vpop.xlane.xlu2 %1393  ;;  %vm1557_vm6 = vweird.f32 %v2756_v57 }
 0x336   : > { %2757 = vrcp.f32 %v1394_v40  ;;  %vm1558_vm8 = vmor %vm1556_vm7, %vm1557_vm6  ;;  %v1576_v52 = vand.u32 2147483648, %v1394_v40  ;;  %v1574_v22 = vand.u32 2147483647, %v1394_v40  ;;  %vm1570_vm11 = vweird.f32 %v1394_v40 }
 0x337   : > { %v1553_v15 = vsub.f32 1.0, %v1552_v1  ;;  %v1131_v1 = vmax.f32 %v3624_v47, %v3626_v50 }
 0x338   : > { %1135 = vmax.xlane.f32.xlu1 %v1134_v53  ;;  %1138 = vmax.xlane.f32.xlu2 %v1137_v61  ;;  %vm1575_vm13 = vcmp.eq.f32.partialorder %v1574_v22, 8.507059e+37 }
 0x339   : > { %v1554_v23 = vmul.f32 %v2756_v57, %v1553_v15 }
 0x33b   : > { %v1555_v49 = vadd.f32 %v2756_v57, %v1554_v23  ;;  %v3873_v51 = vpop.xlane.xlu1 %1156 }
 0x33c   : > { %v2758_v58 = vpop.eup %2757 }
 0x33d   : > { %v1566_v63 = vmul.f32 %v2758_v58, %v1394_v40  ;;  %v1559_v25 = vsel %vm1558_vm8, %v2756_v57, %v1555_v49  ;;  %vm1571_vm10 = vweird.f32 %v2758_v58 }
 0x33e   : > { %v1564_v53 = vsel %vm1561_vm9, %v1563_v5, %v1559_v25  ;;  %vm1572_vm12 = vmor %vm1570_vm11, %vm1571_vm10 }
 0x33f   : > { %v1567_v61 = vsub.f32 1.0, %v1566_v63  ;;  %v3878_v15 = vmul.f32 %v3674_v8, %v1564_v53  ;;  %v3881_v48 = vmul.f32 %v3676_v6, %v1564_v53  ;;  %v1577_v8 = vor.u32 1.1754944e-38, %v1576_v52 }
 0x340   : > { %1132 = vmax.xlane.f32.xlu2 %v1131_v1 }
 0x341   : > { %4969 = vst [vmem:[#allocation44_spill] sm:$0xff] %v3878_v15  ;;  %v1568_v23 = vmul.f32 %v2758_v58, %v1567_v61 }
 0x342   : > { %4970 = vst [vmem:[#allocation45_spill] sm:$0xff] %v3881_v48 }
 0x343   : > { %1991 = vst [vmem:[%s3865_s7 + $0x60] sm:$0xff] %v3878_v15  ;;  %v1569_v57 = vadd.f32 %v2758_v58, %v1568_v23  ;;  %v1397_v25 = vpop.xlane.xlu1 %1396 }
 0x344   : > { %1992 = vst [vmem:[%s3865_s7 + $0x68] sm:$0xff] %v3881_v48  ;;  %2759 = vrcp.f32 %v1397_v25  ;;  %vm1584_vm15 = vweird.f32 %v1397_v25 }
 0x345   : > { %v1400_v37 = vpop.xlane.xlu2 %1399  ;;  %v1573_v6 = vsel %vm1572_vm12, %v2758_v58, %v1569_v57 }
 0x346   : > { %2761 = vrcp.f32 %v1400_v37  ;;  %v1578_v49 = vsel %vm1575_vm13, %v1577_v8, %v1573_v6  ;;  %v1588_v8 = vand.u32 2147483647, %v1397_v25  ;;  %v1604_v6 = vand.u32 2147483648, %v1400_v37 }
 0x347   : > { %v3888_v5 = vmul.f32 %v3686_v27, %v1578_v49  ;;  %v3891_v63 = vmul.f32 %v3688_v30, %v1578_v49  ;;  %v1590_v30 = vand.u32 2147483648, %v1397_v25  ;;  %v1602_v50 = vand.u32 2147483647, %v1400_v37 }
 0x348   : > { %vm1598_vm3 = vweird.f32 %v1400_v37  ;;  %vm1589_vm4 = vcmp.eq.f32.partialorder %v1588_v8, 8.507059e+37  ;;  %v4974_v8 = vld [vmem:[#allocation31_spill] sm:$0xff] }
 0x349   : > { %4971 = vst [vmem:[#allocation46_spill] sm:$0xff] %v3888_v5  ;;  %v1591_v52 = vor.u32 1.1754944e-38, %v1590_v30  ;;  %vm1603_vm6 = vcmp.eq.f32.partialorder %v1602_v50, 8.507059e+37 }
 0x34a   : > { %4972 = vst [vmem:[#allocation47_spill] sm:$0xff] %v3891_v63  ;;  %v2760_v1 = vpop.eup %2759 }
 0x34b   : > { %1993 = vst [vmem:[%s3865_s7 + $0x70] sm:$0xff] %v3888_v5  ;;  %v1580_v53 = vmul.f32 %v2760_v1, %v1397_v25  ;;  %v3899_v58 = vpop.xlane.xlu1 %1162  ;;  %vm1585_vm14 = vweird.f32 %v2760_v1  ;;  %v4975_v5 = vld [vmem:[#allocation32_spill] sm:$0xff] }
 0x34c   : > { %1994 = vst [vmem:[%s3865_s7 + $0x78] sm:$0xff] %v3891_v63  ;;  %v2762_v61 = vpop.eup %2761  ;;  %vm1586_vm2 = vmor %vm1584_vm15, %vm1585_vm14  ;;  %v1231_v56 = vsub.f32 %v4975_v5, %v3899_v58 }
 0x34d   : > { %v1581_v27 = vsub.f32 1.0, %v1580_v53  ;;  %v1594_v23 = vmul.f32 %v2762_v61, %v1400_v37  ;;  %vm1599_vm1 = vweird.f32 %v2762_v61 }
 0x34e   : > { %vm1600_vm5 = vmor %vm1598_vm3, %vm1599_vm1 }
 0x34f   : > { %v1582_v22 = vmul.f32 %v2760_v1, %v1581_v27  ;;  %v1595_v57 = vsub.f32 1.0, %v1594_v23  ;;  %v1605_v27 = vor.u32 1.1754944e-38, %v1604_v6 }
 0x351   : > { %v1583_v49 = vadd.f32 %v2760_v1, %v1582_v22  ;;  %v1596_v40 = vmul.f32 %v2762_v61, %v1595_v57 }
 0x353   : > { %v1597_v47 = vadd.f32 %v2762_v61, %v1596_v40  ;;  %v1403_v48 = vpop.xlane.xlu1 %1402  ;;  %v3903_v63 = vpop.xlane.xlu2 %1165  ;;  %v1587_v53 = vsel %vm1586_vm2, %v2760_v1, %v1583_v49  ;;  %v4973_v40 = vld [vmem:[#allocation30_spill] sm:$0xff]  ;;  %v566_v1 = vld [vmem:[#allocation12] sm:$0xff] }
 0x354   : > { %2763 = vrcp.f32 %v1403_v48  ;;  %v1592_v25 = vsel %vm1589_vm4, %v1591_v52, %v1587_v53  ;;  %2477 = vmatmul.msk.f32.vlgmr.msra.gmra.mxu0 %vm476_vm0, %v566_v1  ;;  %2485 = vmatmul.msk.f32.vlgmr.msra.gmra.mxu1 %vm476_vm0, %v566_v1  ;;  %vm1612_vm8 = vweird.f32 %v1403_v48 }
 0x355   : > { %v1601_v23 = vsel %vm1600_vm5, %v2762_v61, %v1597_v47  ;;  %v3906_v57 = vmul.f32 %v3700_v12, %v1592_v25  ;;  %v3912_v30 = vmul.f32 %v4973_v40, %v1592_v25  ;;  %v1616_v25 = vand.u32 2147483647, %v1403_v48 }
 0x356   : > { %v1606_v22 = vsel %vm1603_vm6, %v1605_v27, %v1601_v23  ;;  %v1618_v27 = vand.u32 2147483648, %v1403_v48  ;;  %v567_v23 = vld [vmem:[#allocation12 + $0x8] sm:$0xff] }
 0x357   : > { %v3909_v37 = vmul.f32 %v3710_v42, %v1606_v22  ;;  %1995 = vst [vmem:[%s3865_s7 + $0x80] sm:$0xff] %v3906_v57  ;;  %v3917_v6 = vmul.f32 %v4974_v8, %v1606_v22  ;;  %vm1617_vm10 = vcmp.eq.f32.partialorder %v1616_v25, 8.507059e+37  ;;  %v568_v25 = vld [vmem:[#allocation12 + $0x10] sm:$0xff] }
 0x358   : > { %1996 = vst [vmem:[%s3865_s7 + $0x88] sm:$0xff] %v3912_v30  ;;  %v1619_v1 = vor.u32 1.1754944e-38, %v1618_v27 }
 0x359   : > { %1997 = vst [vmem:[%s3865_s7 + $0x90] sm:$0xff] %v3909_v37 }
 0x35a   : > { %v2764_v50 = vpop.eup %2763  ;;  %1998 = vst [vmem:[%s3865_s7 + $0x98] sm:$0xff] %v3917_v6 }
 0x35b   : > { %v1608_v42 = vmul.f32 %v2764_v50, %v1403_v48  ;;  %v1406_v52 = vpop.xlane.xlu2 %1405  ;;  %v3929_v61 = vpop.xlane.xlu1 %1168  ;;  %vm1613_vm7 = vweird.f32 %v2764_v50 }
 0x35c   : > { %2765 = vrcp.f32 %v1406_v52  ;;  %2478 = vmatmul.msk.f32.gmra.mxu0 %vm476_vm0, %v567_v23  ;;  %2486 = vmatmul.msk.f32.gmra.mxu1 %vm476_vm0, %v567_v23  ;;  %vm1614_vm9 = vmor %vm1612_vm8, %vm1613_vm7  ;;  %v1632_v15 = vand.u32 2147483648, %v1406_v52  ;;  %v1630_v62 = vand.u32 2147483647, %v1406_v52  ;;  %vm1626_vm12 = vweird.f32 %v1406_v52 }
 0x35d   : > { %v1609_v49 = vsub.f32 1.0, %v1608_v42 }
 0x35e   : > { %vm1631_vm14 = vcmp.eq.f32.partialorder %v1630_v62, 8.507059e+37 }
 0x35f   : > { %v1610_v53 = vmul.f32 %v2764_v50, %v1609_v49 }
 0x361   : > { %v1611_v22 = vadd.f32 %v2764_v50, %v1610_v53 }
 0x362   : > { %v2766_v40 = vpop.eup %2765 }
 0x363   : > { %v1622_v8 = vmul.f32 %v2766_v40, %v1406_v52  ;;  %v3935_v12 = vpop.xlane.xlu1 %1408  ;;  %v3937_v47 = vpop.xlane.xlu2 %1171  ;;  %v1615_v42 = vsel %vm1614_vm9, %v2764_v50, %v1611_v22  ;;  %vm1627_vm11 = vweird.f32 %v2766_v40 }
 0x364   : > { %2767 = vrcp.f32 %v3935_v12  ;;  %v1620_v48 = vsel %vm1617_vm10, %v1619_v1, %v1615_v42  ;;  %vm1628_vm13 = vmor %vm1626_vm12, %vm1627_vm11  ;;  %2479 = vmatmul.msk.f32.gmra.mxu0 %vm476_vm0, %v568_v25  ;;  %2487 = vmatmul.msk.f32.gmra.mxu1 %vm476_vm0, %v568_v25  ;;  %v1347_v42 = vmul.f32 1.442695, %v1231_v56  ;;  %v1646_v25 = vand.u32 2147483648, %v3935_v12 }
 0x365   : > { %v1623_v49 = vsub.f32 1.0, %v1622_v8  ;;  %v3941_v53 = vmul.f32 %v3726_v17, %v1620_v48  ;;  %v3944_v23 = vmul.f32 %v3728_v35, %v1620_v48  ;;  %v1633_v17 = vor.u32 1.1754944e-38, %v1632_v15 }
 0x366   : > { %v1235_v15 = vsub.f32 %v3746_v43, %v3929_v61  ;;  %v1644_v43 = vand.u32 2147483647, %v3935_v12  ;;  %vm1640_vm1 = vweird.f32 %v3935_v12 }
 0x367   : > { %v1624_v27 = vmul.f32 %v2766_v40, %v1623_v49  ;;  %1999 = vst [vmem:[%s3865_s7 + $0xa0] sm:$0xff] %v3941_v53 }
 0x368   : > { %2000 = vst [vmem:[%s3865_s7 + $0xa8] sm:$0xff] %v3944_v23  ;;  %vm1645_vm3 = vcmp.eq.f32.partialorder %v1644_v43, 8.507059e+37 }
 0x369   : > { %v1625_v50 = vadd.f32 %v2766_v40, %v1624_v27 }
 0x36a   : > { %v2768_v22 = vpop.eup %2767 }
 0x36b   : > { %v1636_v35 = vmul.f32 %v2768_v22, %v3935_v12  ;;  %v3955_v1 = vpop.xlane.xlu2 %1411  ;;  %v1175_v5 = vpop.xlane.xlu1 %1174  ;;  %v1629_v8 = vsel %vm1628_vm13, %v2766_v40, %v1625_v50  ;;  %vm1641_vm15 = vweird.f32 %v2768_v22  ;;  %v1647_v12 = vor.u32 1.1754944e-38, %v1646_v25 }
 0x36c   : > { %2769 = vrcp.f32 %v3955_v1  ;;  %v1239_v49 = vsub.f32 %v3778_v33, %v1175_v5  ;;  %v1240_v48 = vsub.f32 %v3780_v13, %v1175_v5  ;;  %v1634_v27 = vsel %vm1631_vm14, %v1633_v17, %v1629_v8  ;;  %v4976_v33 = vld [vmem:[#allocation33_spill] sm:$0xff]  ;;  %v4977_v5 = vld [vmem:[#allocation28_spill] sm:$0xff]  ;;  %vm3984_vm2 = vmor %vm1640_vm1, %vm1641_vm15 }
 0x36d   : > { %v1637_v52 = vsub.f32 1.0, %v1636_v35  ;;  %v3964_v59 = vmul.f32 %v3740_v16, %v1634_v27  ;;  %v3967_v62 = vmul.f32 %v3742_v32, %v1634_v27  ;;  %v1232_v13 = vsub.f32 %v4976_v33, %v3899_v58  ;;  %v569_v16 = vld [vmem:[#allocation12 + $0x18] sm:$0xff]  ;;  %v4980_v33 = vld [vmem:[#allocation36_spill] sm:$0xff] }
 0x36e   : > { %v1363_v40 = vmul.f32 1.442695, %v1239_v49  ;;  %v1365_v50 = vmul.f32 1.442695, %v1240_v48  ;;  %v1236_v17 = vsub.f32 %v3748_v9, %v3929_v61  ;;  %v1227_v8 = vsub.f32 %v4977_v5, %v3873_v51  ;;  %2480 = vmatmul.msk.f32.gmra.mxu0 %vm476_vm0, %v569_v16  ;;  %2488 = vmatmul.msk.f32.gmra.mxu1 %vm476_vm0, %v569_v16 }
 0x36f   : > { %v1638_v56 = vmul.f32 %v2768_v22, %v1637_v52  ;;  %2001 = vst [vmem:[%s3865_s7 + $0xb0] sm:$0xff] %v3964_v59  ;;  %v1355_v58 = vmul.f32 1.442695, %v1235_v15  ;;  %v1349_v27 = vmul.f32 1.442695, %v1232_v13  ;;  %vm1654_vm5 = vweird.f32 %v3955_v1 }
 0x370   : > { %2771 = vpow2.f32 %v1363_v40  ;;  %2002 = vst [vmem:[%s3865_s7 + $0xb8] sm:$0xff] %v3967_v62  ;;  %v1357_v15 = vmul.f32 1.442695, %v1236_v17 }
 0x371   : > { %v1639_v35 = vadd.f32 %v2768_v22, %v1638_v56  ;;  %2773 = vpow2.f32 %v1365_v50  ;;  %v1237_v50 = vsub.f32 %v3760_v14, %v3937_v47  ;;  %v4982_v14 = vld [vmem:[#allocation38_spill] sm:$0xff] }
 0x372   : > { %v3979_v32 = vpop.eup %2769  ;;  %2775 = vpow2.f32 %v1347_v42  ;;  %v1238_v5 = vsub.f32 %v4982_v14, %v3937_v47 }
 0x373   : > { %v1650_v61 = vmul.f32 %v3979_v32, %v3955_v1  ;;  %v3992_v52 = vpop.xlane.xlu1 %1414  ;;  %v1178_v49 = vpop.xlane.xlu2 %1177  ;;  %v1643_v48 = vsel %vm3984_vm2, %v2768_v22, %v1639_v35  ;;  %v4981_v22 = vld [vmem:[#allocation37_spill] sm:$0xff]  ;;  %vm1655_vm4 = vweird.f32 %v3979_v32 }
 0x374   : > { %2777 = vrcp.f32 %v3992_v52  ;;  %v1241_v40 = vsub.f32 %v3790_v28, %v1178_v49  ;;  %v1242_v42 = vsub.f32 %v3792_v29, %v1178_v49  ;;  %v1648_v25 = vsel %vm1645_vm3, %v1647_v12, %v1643_v48  ;;  %v570_v48 = vld [vmem:[#allocation12 + $0x20] sm:$0xff]  ;;  %vm4033_vm6 = vmor %vm1654_vm5, %vm1655_vm4 }
 0x375   : > { %v1651_v56 = vsub.f32 1.0, %v1650_v61  ;;  %2779 = vpow2.f32 %v1355_v58  ;;  %v4002_v16 = vmul.f32 %v4980_v33, %v1648_v25  ;;  %v4005_v13 = vmul.f32 %v4981_v22, %v1648_v25 }
 0x376   : > { %v4007_v17 = vpop.eup %2771  ;;  %v1367_v28 = vmul.f32 1.442695, %v1241_v40  ;;  %v1369_v29 = vmul.f32 1.442695, %v1242_v42  ;;  %2781 = vpow2.f32 %v1357_v15  ;;  %v1660_v58 = vand.u32 2147483648, %v3955_v1  ;;  %v4984_v15 = vld [vmem:[#allocation29_spill] sm:$0xff]  ;;  %2481 = vmatmul.msk.f32.gmra.mxu0 %vm476_vm0, %v570_v48  ;;  %2489 = vmatmul.msk.f32.gmra.mxu1 %vm476_vm0, %v570_v48 }
 0x377   : > { %v1652_v43 = vmul.f32 %v3979_v32, %v1651_v56  ;;  %v4011_v35 = vpop.eup %2773  ;;  %2003 = vst [vmem:[%s3865_s7 + $0xc0] sm:$0xff] %v4002_v16  ;;  %v1658_v61 = vand.u32 2147483647, %v3955_v1  ;;  %v1228_v56 = vsub.f32 %v4984_v15, %v3873_v51  ;;  %v1359_v40 = vmul.f32 1.442695, %v1237_v50  ;;  %v4987_v1 = vld [vmem:[#allocation34_spill] sm:$0xff] }
 0x378   : > { %v4019_v9 = vpop.eup %2775  ;;  %2783 = vpow2.f32 %v1367_v28  ;;  %v1461_v49 = vadd.f32 %v4011_v35, %v4007_v17  ;;  %2004 = vst [vmem:[%s3865_s7 + $0xc8] sm:$0xff] %v4005_v13  ;;  %v1233_v25 = vsub.f32 %v4987_v1, %v3903_v63  ;;  %v4988_v28 = vld [vmem:[#allocation35_spill] sm:$0xff]  ;;  %v1661_v14 = vor.u32 1.1754944e-38, %v1660_v58 }
 0x379   : > { %4983 = vst [vmem:[#allocation30_spill] sm:$0xff] %v4019_v9  ;;  %v1653_v12 = vadd.f32 %v3979_v32, %v1652_v43  ;;  %2785 = vpow2.f32 %v1369_v29  ;;  %v1361_v29 = vmul.f32 1.442695, %v1238_v5  ;;  %v1339_v48 = vmul.f32 1.442695, %v1227_v8 }
 0x37a   : > { %v4027_v47 = vpop.eup %2777  ;;  %2787 = vpow2.f32 %v1349_v27  ;;  %1462 = vadd.xlane.f32.xlu2 %v1461_v49  ;;  %v1234_v27 = vsub.f32 %v4988_v28, %v3903_v63  ;;  %vm1659_vm7 = vcmp.eq.f32.partialorder %v1658_v61, 8.507059e+37  ;;  %v1341_v1 = vmul.f32 1.442695, %v1228_v56  ;;  %v571_v28 = vld [vmem:[#allocation12 + $0x28] sm:$0xff] }
 0x37b   : > { %v1664_v33 = vmul.f32 %v4027_v47, %v3992_v52  ;;  %v4043_v51 = vpop.xlane.xlu1 %1387  ;;  %v4045_v50 = vpop.xlane.xlu2 %1417  ;;  %v1657_v22 = vsel %vm4033_vm6, %v3979_v32, %v1653_v12  ;;  %v1674_v32 = vand.u32 2147483648, %v3992_v52  ;;  %vm1669_vm8 = vweird.f32 %v4027_v47 }
 0x37c   : > { %v4050_v43 = vpop.eup %2779  ;;  %2789 = vrcp.f32 %v4043_v51  ;;  %v1662_v12 = vsel %vm1659_vm7, %v1661_v14, %v1657_v22  ;;  %v1351_v61 = vmul.f32 1.442695, %v1233_v25  ;;  %v1353_v56 = vmul.f32 1.442695, %v1234_v27 }
 0x37d   : > { %v1665_v49 = vsub.f32 1.0, %v1664_v33  ;;  %2791 = vrcp.f32 %v4045_v50  ;;  %v4056_v15 = vpop.eup %2781  ;;  %v4064_v8 = vmul.f32 %v3768_v24, %v1662_v12  ;;  %v4067_v5 = vmul.f32 %v3772_v41, %v1662_v12 }
 0x37e   : > { %4989 = vst [vmem:[#allocation31_spill] sm:$0xff] %v4056_v15  ;;  %2793 = vpow2.f32 %v1359_v40  ;;  %v4059_v42 = vpop.eup %2783  ;;  %v1672_v40 = vand.u32 2147483647, %v3992_v52  ;;  %vm1668_vm9 = vweird.f32 %v3992_v52  ;;  %v1455_v24 = vadd.f32 %v4056_v15, %v4050_v43  ;;  %2482 = vmatmul.msk.f32.gmra.mxu0 %vm476_vm0, %v571_v28  ;;  %2490 = vmatmul.msk.f32.gmra.mxu1 %vm476_vm0, %v571_v28 }
 0x37f   : > { %v1666_v63 = vmul.f32 %v4027_v47, %v1665_v49  ;;  %v4069_v58 = vpop.eup %2785  ;;  %2795 = vpow2.f32 %v1361_v29  ;;  %2005 = vst [vmem:[%s3865_s7 + $0xd0] sm:$0xff] %v4064_v8  ;;  %vm4086_vm10 = vmor %vm1668_vm9, %vm1669_vm8  ;;  %v1675_v14 = vor.u32 1.1754944e-38, %v1674_v32  ;;  %v1688_v27 = vand.u32 2147483648, %v4045_v50 }
 0x380   : > { %v4072_v33 = vpop.eup %2787  ;;  %v1464_v41 = vadd.f32 %v4069_v58, %v4059_v42  ;;  %2797 = vpow2.f32 %v1339_v48  ;;  %2006 = vst [vmem:[%s3865_s7 + $0xd8] sm:$0xff] %v4067_v5  ;;  %vm1673_vm11 = vcmp.eq.f32.partialorder %v1672_v40, 8.507059e+37  ;;  %vm1542_vm14 = vweird.f32 %v4043_v51 }
 0x381   : > { %4990 = vst [vmem:[#allocation32_spill] sm:$0xff] %v4072_v33  ;;  %v1667_v22 = vadd.f32 %v4027_v47, %v1666_v63  ;;  %2799 = vpow2.f32 %v1341_v1  ;;  %vm1682_vm2 = vweird.f32 %v4045_v50 }
 0x382   : > { %v4082_v25 = vpop.eup %2789  ;;  %1456 = vadd.xlane.f32.xlu2 %v1455_v24  ;;  %1465 = vadd.xlane.f32.xlu1 %v1464_v41  ;;  %2801 = vpow2.f32 %v1351_v61  ;;  %v1548_v24 = vand.u32 2147483648, %v4043_v51 }
 0x383   : > { %v4094_v52 = vpop.eup %2791  ;;  %v1671_v29 = vsel %vm4086_vm10, %v4027_v47, %v1667_v22  ;;  %v1538_v48 = vmul.f32 %v4082_v25, %v4043_v51  ;;  %v4101_v49 = vpop.xlane.xlu1 %1153  ;;  %2803 = vpow2.f32 %v1353_v56  ;;  %v1546_v47 = vand.u32 2147483647, %v4043_v51 }
 0x384   : > { %v1160_v12 = vpop.xlane.xlu2 %1159  ;;  %v4103_v63 = vpop.eup %2793  ;;  %v1678_v1 = vmul.f32 %v4094_v52, %v4045_v50  ;;  %v1676_v32 = vsel %vm1673_vm11, %v1675_v14, %v1671_v29  ;;  %vm1543_vm12 = vweird.f32 %v4082_v25  ;;  %vm1683_vm13 = vweird.f32 %v4094_v52 }
 0x385   : > { %4993 = vst [vmem:[#allocation33_spill] sm:$0xff] %v4103_v63  ;;  %v1539_v28 = vsub.f32 1.0, %v1538_v48  ;;  %v4108_v22 = vpop.eup %2795  ;;  %v4113_v15 = vmul.f32 %v3786_v44, %v1676_v32  ;;  %v1229_v56 = vsub.f32 %v3706_v38, %v1160_v12  ;;  %v1944_v40 = vmul.f32 %v3788_v45, %v1676_v32  ;;  %v572_v32 = vld [vmem:[#allocation12 + $0x30] sm:$0xff]  ;;  %vm4140_vm15 = vmor %vm1542_vm14, %vm1543_vm12 }
 0x386   : > { %4994 = vst [vmem:[#allocation28_spill] sm:$0xff] %v4108_v22  ;;  %v1679_v41 = vsub.f32 1.0, %v1678_v1  ;;  %v4119_v29 = vpop.eup %2797  ;;  %v1686_v48 = vand.u32 2147483647, %v4045_v50  ;;  %v1230_v44 = vsub.f32 %v3708_v39, %v1160_v12  ;;  %v1449_v38 = vadd.f32 %v4072_v33, %v4019_v9  ;;  %2483 = vmatmul.msk.f32.gmra.mxu0 %vm476_vm0, %v572_v32  ;;  %2491 = vmatmul.msk.f32.gmra.mxu1 %vm476_vm0, %v572_v32  ;;  %vm4156_vm3 = vmor %vm1682_vm2, %vm1683_vm13 }
 0x387   : > { %v1540_v61 = vmul.f32 %v4082_v25, %v1539_v28  ;;  %2007 = vst [vmem:[%s3865_s7 + $0xe0] sm:$0xff] %v4113_v15  ;;  %v4127_v1 = vpop.eup %2799  ;;  %v1458_v45 = vadd.f32 %v4108_v22, %v4103_v63  ;;  %vm4144_vm1 = vcmp.eq.f32.partialorder %v1546_v47, 8.507059e+37  ;;  %v1549_v33 = vor.u32 1.1754944e-38, %v1548_v24 }
 0x388   : > { %v1680_v14 = vmul.f32 %v4094_v52, %v1679_v41  ;;  %2008 = vst [vmem:[%s3865_s7 + $0xe8] sm:$0xff] %v1944_v40  ;;  %v4136_v41 = vpop.eup %2801  ;;  %v1689_v47 = vor.u32 1.1754944e-38, %v1688_v27  ;;  %v1343_v22 = vmul.f32 1.442695, %v1229_v56  ;;  %vm1687_vm4 = vcmp.eq.f32.partialorder %v1686_v48, 8.507059e+37 }
 0x389   : > { %v1541_v28 = vadd.f32 %v4082_v25, %v1540_v61  ;;  %v4152_v61 = vpop.eup %2803  ;;  %v1345_v63 = vmul.f32 1.442695, %v1230_v44  ;;  %v1225_v27 = vsub.f32 %v3682_v0, %v4101_v49 }
 0x38a   : > { %v1681_v51 = vadd.f32 %v4094_v52, %v1680_v14  ;;  %1450 = vadd.xlane.f32.xlu2 %v1449_v38  ;;  %1459 = vadd.xlane.f32.xlu1 %v1458_v45 }
 0x38b   : > { %v4160_v14 = vpop.xlane.xlu1 %1381  ;;  %v1545_v32 = vsel %vm4140_vm15, %v4082_v25, %v1541_v28  ;;  %v1226_v25 = vsub.f32 %v3684_v26, %v4101_v49  ;;  %v5001_v26 = vld [vmem:[#allocation39_spill] sm:$0xff] }
 0x38c   : > { %v1151_v50 = vpop.xlane.xlu2 %1150  ;;  %v1685_v24 = vsel %vm4156_vm3, %v4094_v52, %v1681_v51  ;;  %2805 = vrcp.f32 %v4160_v14  ;;  %v1550_v48 = vsel %vm4144_vm1, %v1549_v33, %v1545_v32  ;;  %v573_v33 = vld [vmem:[#allocation12 + $0x38] sm:$0xff]  ;;  %v2063_v32 = vpack.c.bf16 %v4064_v8, %v4002_v16 }
 0x38d   : > { %v1223_v56 = vsub.f32 %v3670_v46, %v1151_v50  ;;  %v1224_v38 = vsub.f32 %v3672_v2, %v1151_v50  ;;  %v1690_v45 = vsel %vm1687_vm4, %v1689_v47, %v1685_v24  ;;  %2807 = vpow2.f32 %v1343_v22 }
 0x38e   : > { %v1945_v9 = vmul.f32 %v3802_v21, %v1690_v45  ;;  %v1946_v52 = vmul.f32 %v3804_v20, %v1690_v45  ;;  %v4180_v46 = vmul.f32 %v3798_v11, %v1550_v48  ;;  %2809 = vpow2.f32 %v1345_v63  ;;  %2484 = vmatmul.msk.f32.gmra.mxu0 %vm476_vm0, %v573_v33  ;;  %2492 = vmatmul.msk.f32.gmra.mxu1 %vm476_vm0, %v573_v33 }
 0x38f   : > { %v1331_v44 = vmul.f32 1.442695, %v1223_v56  ;;  %v1333_v28 = vmul.f32 1.442695, %v1224_v38  ;;  %v4185_v49 = vmul.f32 %v5001_v26, %v1550_v48  ;;  %v1443_v21 = vadd.f32 %v4127_v1, %v4119_v29 }
 0x390   : > { %2009 = vst [vmem:[%s3865_s7 + $0xf0] sm:$0xff] %v1945_v9  ;;  %v2065_v2 = vpack.c.bf16 %v1945_v9, %v4113_v15  ;;  %v2066_v0 = vpack.c.bf16 %v1946_v52, %v1944_v40  ;;  %v1452_v20 = vadd.f32 %v4152_v61, %v4136_v41  ;;  %v1335_v15 = vmul.f32 1.442695, %v1225_v27 }
 0x391   : > { %2811 = vpow2.f32 %v1331_v44  ;;  %2010 = vst [vmem:[%s3865_s7 + $0xf8] sm:$0xff] %v1946_v52  ;;  %v1337_v39 = vmul.f32 1.442695, %v1226_v25  ;;  %v1520_v56 = vand.u32 2147483648, %v4160_v14  ;;  %v1518_v45 = vand.u32 2147483647, %v4160_v14 }
 0x392   : > { %v2806_v11 = vpop.eup %2805  ;;  %2813 = vpow2.f32 %v1333_v28  ;;  %2083 = vmatpush.bf16.xpose.msrb.mxu0 %v2065_v2  ;;  %2112 = vmatpush.bf16.xpose.msrb.mxu1 %v2066_v0  ;;  %1989 = vst [vmem:[%s3865_s7 + $0x50] sm:$0xff] %v4180_v46  ;;  %vm1514_vm0 = vweird.f32 %v4160_v14 }
 0x393   : > { %v1510_v63 = vmul.f32 %v2806_v11, %v4160_v14  ;;  %1444 = vadd.xlane.f32.xlu2 %v1443_v21  ;;  %1453 = vadd.xlane.f32.xlu1 %v1452_v20  ;;  %v1148_v22 = vpop.xlane.xlu1 %1147  ;;  %1990 = vst [vmem:[%s3865_s7 + $0x58] sm:$0xff] %v4185_v49  ;;  %v4202_v12 = vpop.eup %2807  ;;  %vm1515_vm5 = vweird.f32 %v2806_v11  ;;  %vm1519_vm7 = vcmp.eq.f32.partialorder %v1518_v45, 8.507059e+37 }
 0x394   : > { %v4195_v40 = vpop.xlane.xlu2 %1378  ;;  %v4204_v47 = vpop.eup %2809  ;;  %v1221_v50 = vsub.f32 %v3664_v31, %v1148_v22  ;;  %v1222_v25 = vsub.f32 %v3666_v34, %v1148_v22  ;;  %v2064_v31 = vpack.c.bf16 %v4067_v5, %v4005_v13  ;;  %vm4223_vm6 = vmor %vm1514_vm0, %vm1515_vm5  ;;  %v1521_v34 = vor.u32 1.1754944e-38, %v1520_v56 }
 0x395   : > { %2815 = vrcp.f32 %v4195_v40  ;;  %v1511_v51 = vsub.f32 1.0, %v1510_v63  ;;  %v1446_v16 = vadd.f32 %v4204_v47, %v4202_v12  ;;  %v1506_v63 = vand.u32 2147483648, %v4195_v40 }
 0x396   : > { %2817 = vpow2.f32 %v1335_v15  ;;  %v1327_v44 = vmul.f32 1.442695, %v1221_v50  ;;  %v1329_v2 = vmul.f32 1.442695, %v1222_v25  ;;  %v2061_v50 = vpack.c.bf16 %v3964_v59, %v3941_v53 }
 0x397   : > { %v4209_v24 = vpop.eup %2811  ;;  %v1512_v27 = vmul.f32 %v2806_v11, %v1511_v51  ;;  %2819 = vpow2.f32 %v1337_v39  ;;  %vm1500_vm9 = vweird.f32 %v4195_v40  ;;  %v1507_v59 = vor.u32 1.1754944e-38, %v1506_v63 }
 0x398   : > { %v4212_v38 = vpop.eup %2813 }
 0x399   : > { %v1513_v9 = vadd.f32 %v2806_v11, %v1512_v27  ;;  %v1437_v8 = vadd.f32 %v4212_v38, %v4209_v24 }
 0x39a   : > { %2084 = vmatpush.bf16.xpose.msrb.mxu0 %v2063_v32  ;;  %2113 = vmatpush.bf16.xpose.msrb.mxu1 %v2064_v31  ;;  %v2062_v32 = vpack.c.bf16 %v3967_v62, %v3944_v23 }
 0x39b   : > { %v2816_v52 = vpop.eup %2815  ;;  %1447 = vadd.xlane.f32.xlu1 %v1446_v16  ;;  %1438 = vadd.xlane.f32.xlu2 %v1437_v8  ;;  %v4228_v5 = vpop.xlane.xlu1 %1375  ;;  %v1517_v28 = vsel %vm4223_vm6, %v2806_v11, %v1513_v9 }
 0x39c   : > { %v1496_v13 = vmul.f32 %v2816_v52, %v4195_v40  ;;  %v1145_v14 = vpop.xlane.xlu2 %1144  ;;  %2821 = vrcp.f32 %v4228_v5  ;;  %v4233_v0 = vpop.eup %2817  ;;  %v1522_v33 = vsel %vm1519_vm7, %v1521_v34, %v1517_v28  ;;  %vm1501_vm8 = vweird.f32 %v2816_v52 }
 0x39d   : > { %v1219_v21 = vsub.f32 %v3650_v18, %v1145_v14  ;;  %v1220_v20 = vsub.f32 %v3652_v19, %v1145_v14  ;;  %v4237_v15 = vpop.eup %2819  ;;  %2823 = vpow2.f32 %v1327_v44  ;;  %v4241_v11 = vmul.f32 %v3822_v4, %v1522_v33  ;;  %vm4258_vm10 = vmor %vm1500_vm9, %vm1501_vm8 }
 0x39e   : > { %v1497_v26 = vsub.f32 1.0, %v1496_v13  ;;  %v4244_v22 = vmul.f32 %v3824_v3, %v1522_v33  ;;  %2825 = vpow2.f32 %v1329_v2  ;;  %v1504_v19 = vand.u32 2147483647, %v4195_v40 }
 0x39f   : > { %v1323_v51 = vmul.f32 1.442695, %v1219_v21  ;;  %v1325_v18 = vmul.f32 1.442695, %v1220_v20  ;;  %1985 = vst [vmem:[%s3865_s7 + $0x30] sm:$0xff] %v4241_v11  ;;  %v1440_v3 = vadd.f32 %v4237_v15, %v4233_v0  ;;  %v1492_v14 = vand.u32 2147483648, %v4228_v5 }
 0x3a0   : > { %v1498_v39 = vmul.f32 %v2816_v52, %v1497_v26  ;;  %1986 = vst [vmem:[%s3865_s7 + $0x38] sm:$0xff] %v4244_v22  ;;  %vm1505_vm11 = vcmp.eq.f32.partialorder %v1504_v19, 8.507059e+37  ;;  %vm1486_vm13 = vweird.f32 %v4228_v5  ;;  %v5009_v20 = vpack.c.bf16 %v3917_v6, %v3912_v30 }
 0x3a1   : > { %2827 = vpow2.f32 %v1323_v51  ;;  %v1493_v33 = vor.u32 1.1754944e-38, %v1492_v14  ;;  %v5015_v14 = vld [vmem:[#allocation44_spill] sm:$0xff] }
 0x3a2   : > { %v1499_v4 = vadd.f32 %v2816_v52, %v1498_v39  ;;  %v2822_v27 = vpop.eup %2821  ;;  %2829 = vpow2.f32 %v1325_v18  ;;  %2085 = vmatpush.bf16.xpose.msrb.mxu0 %v2061_v50  ;;  %2114 = vmatpush.bf16.xpose.msrb.mxu1 %v2062_v32  ;;  %v5011_v32 = vld [vmem:[#allocation27_spill] sm:$0xff] }
 0x3a3   : > { %v1482_v53 = vmul.f32 %v2822_v27, %v4228_v5  ;;  %1441 = vadd.xlane.f32.xlu1 %v1440_v3  ;;  %v1142_v23 = vpop.xlane.xlu1 %1141  ;;  %v4267_v45 = vpop.eup %2823  ;;  %vm1487_vm12 = vweird.f32 %v2822_v27 }
 0x3a4   : > { %v4263_v62 = vpop.xlane.xlu2 %1372  ;;  %v1503_v40 = vsel %vm4258_vm10, %v2816_v52, %v1499_v4  ;;  %v1217_v25 = vsub.f32 %v3644_v7, %v1142_v23  ;;  %v1218_v31 = vsub.f32 %v3646_v10, %v1142_v23  ;;  %v4272_v8 = vpop.eup %2825  ;;  %v1490_v10 = vand.u32 2147483647, %v4228_v5  ;;  %vm4295_vm14 = vmor %vm1486_vm13, %vm1487_vm12 }
 0x3a5   : > { %2831 = vrcp.f32 %v4263_v62  ;;  %v1483_v9 = vsub.f32 1.0, %v1482_v53  ;;  %v1508_v16 = vsel %vm1505_vm11, %v1507_v59, %v1503_v40  ;;  %v5008_v5 = vpack.c.bf16 %v3909_v37, %v3906_v57  ;;  %v5010_v37 = vld [vmem:[#allocation26_spill] sm:$0xff] }
 0x3a6   : > { %v1319_v48 = vmul.f32 1.442695, %v1217_v25  ;;  %v1321_v44 = vmul.f32 1.442695, %v1218_v31  ;;  %v4275_v34 = vmul.f32 %v3834_v36, %v1508_v16  ;;  %v4278_v52 = vmul.f32 %v3836_v60, %v1508_v16 }
 0x3a7   : > { %v4280_v13 = vpop.eup %2827  ;;  %v1484_v7 = vmul.f32 %v2822_v27, %v1483_v9  ;;  %v1434_v60 = vadd.f32 %v4272_v8, %v4267_v45  ;;  %vm1491_vm15 = vcmp.eq.f32.partialorder %v1490_v10, 8.507059e+37  ;;  %v1476_v4 = vand.u32 2147483647, %v4263_v62  ;;  %v5013_v9 = vld [vmem:[#allocation41_spill] sm:$0xff]  ;;  %v5014_v10 = vld [vmem:[#allocation46_spill] sm:$0xff] }
 0x3a8   : > { %v4284_v28 = vpop.eup %2829  ;;  %2833 = vpow2.f32 %v1319_v48  ;;  %1983 = vst [vmem:[%s3865_s7 + $0x20] sm:$0xff] %v4275_v34  ;;  %v1478_v3 = vand.u32 2147483648, %v4263_v62  ;;  %vm1472_vm2 = vweird.f32 %v4263_v62 }
 0x3a9   : > { %v1485_v36 = vadd.f32 %v2822_v27, %v1484_v7  ;;  %2835 = vpow2.f32 %v1321_v44  ;;  %v1431_v2 = vadd.f32 %v4284_v28, %v4280_v13  ;;  %1984 = vst [vmem:[%s3865_s7 + $0x28] sm:$0xff] %v4278_v52  ;;  %vm1477_vm4 = vcmp.eq.f32.partialorder %v1476_v4, 8.507059e+37 }
 0x3aa   : > { %2086 = vmatpush.bf16.xpose.msrb.mxu0 %v5008_v5  ;;  %2115 = vmatpush.bf16.xpose.msrb.mxu1 %v5009_v20  ;;  %v1479_v7 = vor.u32 1.1754944e-38, %v1478_v3  ;;  %v5020_v20 = vld [vmem:[#allocation24_spill] sm:$0xff] }
 0x3ab   : > { %v2832_v26 = vpop.eup %2831  ;;  %1435 = vadd.xlane.f32.xlu1 %v1434_v60  ;;  %1432 = vadd.xlane.f32.xlu2 %v1431_v2  ;;  %v1136_v39 = vpop.xlane.xlu1 %1135  ;;  %v1489_v18 = vsel %vm4295_vm14, %v2822_v27, %v1485_v36  ;;  %v5016_v36 = vpack.c.bf16 %v5014_v10, %v5015_v14  ;;  %v5017_v60 = vld [vmem:[#allocation47_spill] sm:$0xff]  ;;  %v5018_v2 = vld [vmem:[#allocation45_spill] sm:$0xff]  ;;  %v2881_v3 = vld [vmem:[%s3865_s7 + $0x40] sm:$0xff] }
 0x3ac   : > { %v1468_v63 = vmul.f32 %v2832_v26, %v4263_v62  ;;  %v1139_v51 = vpop.xlane.xlu2 %1138  ;;  %v1213_v19 = vsub.f32 %v3630_v54, %v1136_v39  ;;  %v1214_v57 = vsub.f32 %v3632_v55, %v1136_v39  ;;  %v1494_v56 = vsel %vm1491_vm15, %v1493_v33, %v1489_v18  ;;  %v5012_v54 = vld [vmem:[#allocation40_spill] sm:$0xff]  ;;  %v5022_v18 = vld [vmem:[#allocation42_spill] sm:$0xff] }
 0x3ad   : > { %v1215_v50 = vsub.f32 %v5010_v37, %v1139_v51  ;;  %v1216_v30 = vsub.f32 %v5011_v32, %v1139_v51  ;;  %v1917_v40 = vmul.f32 %v5012_v54, %v1494_v56  ;;  %vm1473_vm1 = vweird.f32 %v2832_v26  ;;  %v574_v14 = vld [vmem:[#allocation14] sm:$0xff] }
 0x3ae   : > { %v1469_v6 = vsub.f32 1.0, %v1468_v63  ;;  %v4314_v59 = vpop.eup %2833  ;;  %v1311_v53 = vmul.f32 1.442695, %v1213_v19  ;;  %v1313_v27 = vmul.f32 1.442695, %v1214_v57  ;;  %v1918_v16 = vmul.f32 %v5013_v9, %v1494_v56  ;;  %vm1474_vm3 = vmor %vm1472_vm2, %vm1473_vm1  ;;  %v5021_v63 = vld [vmem:[#allocation25_spill] sm:$0xff] }
 0x3af   : > { %v1315_v23 = vmul.f32 1.442695, %v1215_v50  ;;  %v4317_v55 = vpop.eup %2835  ;;  %v1317_v31 = vmul.f32 1.442695, %v1216_v30  ;;  %1981 = vst [vmem:[%s3865_s7 + $0x10] sm:$0xff] %v1917_v40  ;;  %v5019_v21 = vpack.c.bf16 %v5017_v60, %v5018_v2  ;;  %v5023_v57 = vld [vmem:[#allocation43_spill] sm:$0xff]  ;;  %v2055_v56 = vpack.c.bf16 %v4180_v46, %v2881_v3 }
 0x3b0   : > { %v1470_v25 = vmul.f32 %v2832_v26, %v1469_v6  ;;  %2837 = vpow2.f32 %v1311_v53  ;;  %v1428_v48 = vadd.f32 %v4317_v55, %v4314_v59  ;;  %1982 = vst [vmem:[%s3865_s7 + $0x18] sm:$0xff] %v1918_v16  ;;  %v2882_v53 = vld [vmem:[%s3865_s7 + $0x48] sm:$0xff]  ;;  %v2054_v9 = vpack.c.bf16 %v4244_v22, %v4278_v52  ;;  %v576_v60 = vld [vmem:[#allocation14 + $0x10] sm:$0xff] }
 0x3b1   : > { %2839 = vpow2.f32 %v1313_v27  ;;  %v2056_v27 = vpack.c.bf16 %v4185_v49, %v2882_v53  ;;  %v2053_v49 = vpack.c.bf16 %v4241_v11, %v4275_v34  ;;  %v577_v34 = vld [vmem:[#allocation14 + $0x18] sm:$0xff] }
 0x3b2   : > { %v1471_v44 = vadd.f32 %v2832_v26, %v1470_v25  ;;  %2841 = vpow2.f32 %v1315_v23  ;;  %2087 = vmatpush.bf16.xpose.msrb.mxu0 %v5016_v36  ;;  %2116 = vmatpush.bf16.xpose.msrb.mxu1 %v5019_v21  ;;  %v575_v36 = vld [vmem:[#allocation14 + $0x8] sm:$0xff] }
 0x3b3   : > { %2843 = vpow2.f32 %v1317_v31  ;;  %1429 = vadd.xlane.f32.xlu1 %v1428_v48 }
 0x3b4   : > { %v1133_v5 = vpop.xlane.xlu2 %1132  ;;  %v1475_v62 = vsel %vm1474_vm3, %v2832_v26, %v1471_v44 }
 0x3b5   : > { %v1211_v33 = vsub.f32 %v5020_v20, %v1133_v5  ;;  %v1212_v39 = vsub.f32 %v5021_v63, %v1133_v5  ;;  %v1480_v51 = vsel %vm1477_vm4, %v1479_v7, %v1475_v62  ;;  %v578_v63 = vld [vmem:[#allocation14 + $0x20] sm:$0xff] }
 0x3b6   : > { %v1915_v19 = vmul.f32 %v5022_v18, %v1480_v51  ;;  %v1916_v37 = vmul.f32 %v5023_v57, %v1480_v51  ;;  %v4335_v50 = vpop.eup %2837 }
 0x3b7   : > { %v1307_v32 = vmul.f32 1.442695, %v1211_v33  ;;  %v1309_v30 = vmul.f32 1.442695, %v1212_v39  ;;  %v4337_v6 = vpop.eup %2839  ;;  %v579_v39 = vld [vmem:[#allocation14 + $0x28] sm:$0xff] }
 0x3b8   : > { %1979 = vst [vmem:[%s3865_s7] sm:$0xff] %v1915_v19  ;;  %v4340_v4 = vpop.eup %2841  ;;  %v1422_v26 = vadd.f32 %v4337_v6, %v4335_v50  ;;  %v2051_v48 = vpack.c.bf16 %v1917_v40, %v1915_v19  ;;  %v2052_v44 = vpack.c.bf16 %v1918_v16, %v1916_v37  ;;  %v580_v19 = vld [vmem:[#allocation14 + $0x30] sm:$0xff] }
 0x3b9   : > { %2845 = vpow2.f32 %v1307_v32  ;;  %1980 = vst [vmem:[%s3865_s7 + $0x8] sm:$0xff] %v1916_v37  ;;  %v4349_v23 = vpop.eup %2843  ;;  %v581_v37 = vld [vmem:[#allocation14 + $0x38] sm:$0xff] }
 0x3ba   : > { %2847 = vpow2.f32 %v1309_v30  ;;  %v1425_v54 = vadd.f32 %v4349_v23, %v4340_v4  ;;  %2088 = vmatpush.bf16.xpose.msrb.mxu0 %v2055_v56  ;;  %2117 = vmatpush.bf16.xpose.msrb.mxu1 %v2056_v27 }
 0x3bb   : > { %1423 = vadd.xlane.f32.xlu1 %v1422_v26 }
 0x3bc   : > { %1426 = vadd.xlane.f32.xlu2 %v1425_v54 }
 0x3bf   : > { %v4353_v25 = vpop.eup %2845 }
 0x3c0   : > { %v4355_v31 = vpop.eup %2847 }
 0x3c1   : > { %v1419_v46 = vadd.f32 %v4355_v31, %v4353_v25 }
 0x3c2   : > { %2089 = vmatpush.bf16.xpose.msrb.mxu0 %v2053_v49  ;;  %2118 = vmatpush.bf16.xpose.msrb.mxu1 %v2054_v9 }
 0x3c4   : > { %1420 = vadd.xlane.f32.xlu2 %v1419_v46 }
 0x3ca   : > { %2090 = vmatpush.bf16.xpose.msrb.mxu0 %v2051_v48  ;;  %2119 = vmatpush.bf16.xpose.msrb.mxu1 %v2052_v44 }
 0x3d1   : > { %v631_v7 = vpop.f32.mrf.mxu0  ;;  %v672_v10 = vpop.f32.mrf.mxu1 }
 0x3d2   : > { %v632_v5 = vadd.f32 %v631_v7, %v574_v14  ;;  %v673_v62 = vadd.f32 %v672_v10, %v575_v36 }
 0x3d9   : > { %v634_v2 = vpop.f32.mrf.mxu0  ;;  %v675_v21 = vpop.f32.mrf.mxu1 }
 0x3da   : > { %v635_v11 = vadd.f32 %v634_v2, %v576_v60  ;;  %v676_v20 = vadd.f32 %v675_v21, %v577_v34 }
 0x3dc   : > { %v4363_v22 = vpack.c.bf16 %v635_v11, %v632_v5  ;;  %v4365_v52 = vpack.c.bf16 %v676_v20, %v673_v62 }
 0x3de   : > { %2091 = vmatmul.bf16.vlgmr.msrb.gmra.mxu0 %v4363_v22  ;;  %2120 = vmatmul.bf16.vlgmr.msrb.gmra.mxu1 %v4365_v52 }
 0x3e1   : > { %v637_v40 = vpop.f32.mrf.mxu0  ;;  %v678_v16 = vpop.f32.mrf.mxu1 }
 0x3e2   : > { %v638_v51 = vadd.f32 %v637_v40, %v578_v63  ;;  %v679_v18 = vadd.f32 %v678_v16, %v579_v39 }
 0x3eb   : > { %v640_v57 = vpop.f32.mrf.mxu0  ;;  %v681_v32 = vpop.f32.mrf.mxu1 }
 0x3ec   : > { %v641_v30 = vadd.f32 %v640_v57, %v580_v19  ;;  %v682_v26 = vadd.f32 %v681_v32, %v581_v37 }
 0x3ed   : > { %v1463_v33 = vpop.xlane.xlu2 %1462 }
 0x3ee   : > { %2849 = vrcp.f32 %v1463_v33  ;;  %v4369_v56 = vpack.c.bf16 %v641_v30, %v638_v51  ;;  %v4371_v53 = vpack.c.bf16 %v682_v26, %v679_v18  ;;  %v1898_v44 = vand.u32 2147483648, %v1463_v33 }
 0x3ef   : > { %vm1892_vm0 = vweird.f32 %v1463_v33  ;;  %v1896_v10 = vand.u32 2147483647, %v1463_v33 }
 0x3f0   : > { %5024 = vst [vmem:[#allocation36_spill] sm:$0xff] %v4369_v56  ;;  %2096 = vmatmul.bf16.gmra.mxu0 %v4369_v56  ;;  %2125 = vmatmul.bf16.gmra.mxu1 %v4371_v53  ;;  %v1899_v11 = vor.u32 1.1754944e-38, %v1898_v44 }
 0x3f1   : > { %5025 = vst [vmem:[#allocation37_spill] sm:$0xff] %v4371_v53  ;;  %vm1897_vm7 = vcmp.eq.f32.partialorder %v1896_v10, 8.507059e+37 }
 0x3f3   : > { %v643_v18 = vpop.f32.mrf.mxu0  ;;  %v684_v19 = vpop.f32.mrf.mxu1 }
 0x3f4   : > { %v2850_v3 = vpop.eup %2849 }
 0x3f5   : > { %v1888_v27 = vmul.f32 %v2850_v3, %v1463_v33  ;;  %v1466_v54 = vpop.xlane.xlu1 %1465  ;;  %v4373_v46 = vpop.xlane.xlu2 %1456  ;;  %vm1893_vm5 = vweird.f32 %v2850_v3 }
 0x3f6   : > { %2851 = vrcp.f32 %v1466_v54  ;;  %vm4382_vm6 = vmor %vm1892_vm0, %vm1893_vm5  ;;  %v1910_v20 = vand.u32 2147483647, %v1466_v54  ;;  %v1912_v33 = vand.u32 2147483648, %v1466_v54  ;;  %v1868_v39 = vand.u32 2147483647, %v4373_v46 }
 0x3f7   : > { %v1889_v49 = vsub.f32 1.0, %v1888_v27  ;;  %2853 = vrcp.f32 %v4373_v46  ;;  %v1870_v37 = vand.u32 2147483648, %v4373_v46  ;;  %vm1906_vm9 = vweird.f32 %v1466_v54 }
 0x3f8   : > { %vm4410_vm10 = vcmp.eq.f32.partialorder %v1910_v20, 8.507059e+37  ;;  %vm1864_vm11 = vweird.f32 %v4373_v46  ;;  %v1913_v27 = vor.u32 1.1754944e-38, %v1912_v33  ;;  %vm4439_vm13 = vcmp.eq.f32.partialorder %v1868_v39, 8.507059e+37 }
 0x3f9   : > { %v1890_v9 = vmul.f32 %v2850_v3, %v1889_v49 }
 0x3fb   : > { %v1891_v48 = vadd.f32 %v2850_v3, %v1890_v9 }
 0x3fc   : > { %v4378_v7 = vpop.eup %2851 }
 0x3fd   : > { %v4380_v14 = vpop.eup %2853  ;;  %v1902_v60 = vmul.f32 %v4378_v7, %v1466_v54  ;;  %v4387_v2 = vpop.xlane.xlu1 %1459  ;;  %v1895_v5 = vsel %vm4382_vm6, %v2850_v3, %v1891_v48  ;;  %vm1907_vm8 = vweird.f32 %v4378_v7 }
 0x3fe   : > { %v4389_v21 = vpop.xlane.xlu2 %1450  ;;  %v1860_v62 = vmul.f32 %v4380_v14, %v4373_v46  ;;  %2855 = vrcp.f32 %v4387_v2  ;;  %v1900_v63 = vsel %vm1897_vm7, %v1899_v11, %v1895_v5  ;;  %vm4422_vm12 = vmor %vm1906_vm9, %vm1907_vm8  ;;  %v1882_v49 = vand.u32 2147483647, %v4387_v2 }
 0x3ff   : > { %v1903_v34 = vsub.f32 1.0, %v1902_v60  ;;  %2857 = vrcp.f32 %v4389_v21  ;;  %v4401_v51 = vmul.f32 %v4007_v17, %v1900_v63  ;;  %v4406_v32 = vmul.f32 %v4011_v35, %v1900_v63  ;;  %v5048_v63 = vld [vmem:[#allocation33_spill] sm:$0xff] }
 0x400   : > { %v1861_v40 = vsub.f32 1.0, %v1860_v62  ;;  %v1884_v9 = vand.u32 2147483648, %v4387_v2  ;;  %v1842_v5 = vand.u32 2147483648, %v4389_v21  ;;  %vm1865_vm14 = vweird.f32 %v4380_v14 }
 0x401   : > { %v1904_v16 = vmul.f32 %v4378_v7, %v1903_v34  ;;  %2039 = vst [vmem:[%s3865_s7 + $0x1e0] sm:$0xff] %v4401_v51  ;;  %v1871_v62 = vor.u32 1.1754944e-38, %v1870_v37  ;;  %v582_v34 = vld [vmem:[#allocation14 + $0x40] sm:$0xff]  ;;  %vm1878_vm15 = vweird.f32 %v4387_v2  ;;  %vm4453_vm1 = vcmp.eq.f32.partialorder %v1882_v49, 8.507059e+37  ;;  %vm4468_vm4 = vmor %vm1864_vm11, %vm1865_vm14 }
 0x402   : > { %v1862_v17 = vmul.f32 %v4380_v14, %v1861_v40  ;;  %2040 = vst [vmem:[%s3865_s7 + $0x1e8] sm:$0xff] %v4406_v32  ;;  %v1840_v40 = vand.u32 2147483647, %v4389_v21  ;;  %v1885_v39 = vor.u32 1.1754944e-38, %v1884_v9  ;;  %vm1836_vm3 = vweird.f32 %v4389_v21 }
 0x403   : > { %v1905_v57 = vadd.f32 %v4378_v7, %v1904_v16  ;;  %v583_v16 = vld [vmem:[#allocation14 + $0x48] sm:$0xff]  ;;  %v4461_v37 = vor.u32 1.1754944e-38, %v1842_v5  ;;  %v644_v35 = vadd.f32 %v643_v18, %v582_v34 }
 0x404   : > { %v4408_v30 = vpop.eup %2855  ;;  %v685_v9 = vadd.f32 %v684_v19, %v583_v16  ;;  %v584_v16 = vld [vmem:[#allocation14 + $0x50] sm:$0xff]  ;;  %vm4504_vm6 = vcmp.eq.f32.partialorder %v1840_v40, 8.507059e+37 }
 0x405   : > { %v4418_v3 = vpop.eup %2857  ;;  %v1874_v54 = vmul.f32 %v4408_v30, %v4387_v2  ;;  %v1909_v10 = vsel %vm4422_vm12, %v4378_v7, %v1905_v57  ;;  %v1863_v7 = vadd.f32 %v4380_v14, %v1862_v17  ;;  %vm1879_vm2 = vweird.f32 %v4408_v30  ;;  %v585_v2 = vld [vmem:[#allocation14 + $0x58] sm:$0xff] }
 0x406   : > { %v4430_v48 = vpop.xlane.xlu1 %1453  ;;  %v4432_v44 = vpop.xlane.xlu2 %1444  ;;  %v1832_v60 = vmul.f32 %v4418_v3, %v4389_v21  ;;  %v1914_v57 = vsel %vm4410_vm10, %v1913_v27, %v1909_v10  ;;  %vm1837_vm5 = vweird.f32 %v4418_v3  ;;  %vm4490_vm0 = vmor %vm1878_vm15, %vm1879_vm2 }
 0x407   : > { %2859 = vrcp.f32 %v4430_v48  ;;  %v1875_v11 = vsub.f32 1.0, %v1874_v54  ;;  %v1977_v17 = vmul.f32 %v4059_v42, %v1914_v57  ;;  %v646_v54 = vpop.f32.mrf.mxu0  ;;  %v1978_v27 = vmul.f32 %v4069_v58, %v1914_v57  ;;  %v687_v10 = vpop.f32.mrf.mxu1  ;;  %vm4538_vm11 = vmor %vm1836_vm3, %vm1837_vm5 }
 0x408   : > { %2861 = vrcp.f32 %v4432_v44  ;;  %v1833_v20 = vsub.f32 1.0, %v1832_v60  ;;  %v1854_v60 = vand.u32 2147483647, %v4430_v48  ;;  %v1867_v5 = vsel %vm4468_vm4, %v4380_v14, %v1863_v7 }
 0x409   : > { %v1876_v33 = vmul.f32 %v4408_v30, %v1875_v11  ;;  %2041 = vst [vmem:[%s3865_s7 + $0x1f0] sm:$0xff] %v1977_v17  ;;  %v2081_v46 = vpack.c.bf16 %v1977_v17, %v4401_v51  ;;  %v1856_v34 = vand.u32 2147483648, %v4430_v48  ;;  %v1812_v51 = vand.u32 2147483647, %v4432_v44 }
 0x40a   : > { %v1834_v18 = vmul.f32 %v4418_v3, %v1833_v20  ;;  %2042 = vst [vmem:[%s3865_s7 + $0x1f8] sm:$0xff] %v1978_v27  ;;  %v2082_v14 = vpack.c.bf16 %v1978_v27, %v4406_v32  ;;  %v1814_v17 = vand.u32 2147483648, %v4432_v44  ;;  %vm1850_vm7 = vweird.f32 %v4430_v48 }
 0x40b   : > { %v1877_v26 = vadd.f32 %v4408_v30, %v1876_v33  ;;  %2141 = vmatpush.bf16.xpose.msra.mxu0 %v2081_v46  ;;  %v1872_v40 = vsel %vm4439_vm13, %v1871_v62, %v1867_v5  ;;  %vm1808_vm8 = vweird.f32 %v4432_v44  ;;  %v647_v46 = vadd.f32 %v646_v54, %v584_v16  ;;  %v5050_v5 = vld [vmem:[#allocation28_spill] sm:$0xff] }
 0x40c   : > { %2170 = vmatpush.bf16.xpose.msra.mxu1 %v2082_v14  ;;  %v1835_v27 = vadd.f32 %v4418_v3, %v1834_v18  ;;  %v688_v56 = vadd.f32 %v687_v10, %v585_v2  ;;  %vm4522_vm9 = vcmp.eq.f32.partialorder %v1854_v60, 8.507059e+37  ;;  %vm4529_vm10 = vcmp.eq.f32.partialorder %v1812_v51, 8.507059e+37 }
 0x40d   : > { %v4475_v42 = vpop.eup %2859  ;;  %v1881_v32 = vsel %vm4490_vm0, %v4408_v30, %v1877_v26  ;;  %v1857_v26 = vor.u32 1.1754944e-38, %v1856_v34  ;;  %v1815_v18 = vor.u32 1.1754944e-38, %v1814_v17  ;;  %v1971_v54 = vmul.f32 %v4050_v43, %v1872_v40 }
 0x40e   : > { %v4484_v11 = vpop.eup %2861  ;;  %v1846_v19 = vmul.f32 %v4475_v42, %v4430_v48  ;;  %v4500_v7 = vpop.xlane.xlu1 %1447  ;;  %vm1851_vm12 = vweird.f32 %v4475_v42  ;;  %v1839_v21 = vsel %vm4538_vm11, %v4418_v3, %v1835_v27  ;;  %v4553_v14 = vpack.c.bf16 %v647_v46, %v644_v35 }
 0x40f   : > { %v4502_v20 = vpop.xlane.xlu2 %1438  ;;  %v1804_v57 = vmul.f32 %v4484_v11, %v4432_v44  ;;  %2863 = vrcp.f32 %v4500_v7  ;;  %2035 = vst [vmem:[%s3865_s7 + $0x1c0] sm:$0xff] %v1971_v54  ;;  %v4555_v16 = vpack.c.bf16 %v688_v56, %v685_v9  ;;  %v4557_v2 = vpop.f32.mrf.mxu0  ;;  %vm1809_vm13 = vweird.f32 %v4484_v11  ;;  %vm4581_vm15 = vmor %vm1850_vm7, %vm1851_vm12  ;;  %v587_v9 = vld [vmem:[#allocation14 + $0x68] sm:$0xff] }
 0x410   : > { %v1847_v49 = vsub.f32 1.0, %v1846_v19  ;;  %2865 = vrcp.f32 %v4502_v20  ;;  %v1886_v19 = vsel %vm4453_vm1, %v1885_v39, %v1881_v32  ;;  %v5049_v39 = vld [vmem:[#allocation31_spill] sm:$0xff]  ;;  %v4567_v3 = vpop.f32.mrf.mxu1  ;;  %vm1822_vm14 = vweird.f32 %v4500_v7  ;;  %2101 = vmatmul.bf16.gmra.mxu0 %v4553_v14  ;;  %vm1810_vm1 = vmor %vm1808_vm8, %vm1809_vm13 }
 0x411   : > { %v1805_v53 = vsub.f32 1.0, %v1804_v57  ;;  %v1972_v60 = vmul.f32 %v5049_v39, %v1872_v40  ;;  %v1974_v34 = vmul.f32 %v5050_v5, %v1886_v19  ;;  %2130 = vmatmul.bf16.gmra.mxu1 %v4555_v16  ;;  %v1826_v46 = vand.u32 2147483647, %v4500_v7 }
 0x412   : > { %v1848_v58 = vmul.f32 %v4475_v42, %v1847_v49  ;;  %vm1780_vm3 = vweird.f32 %v4502_v20 }
 0x413   : > { %v1806_v36 = vmul.f32 %v4484_v11, %v1805_v53  ;;  %v1973_v53 = vmul.f32 %v5048_v63, %v1886_v19  ;;  %v2080_v49 = vpack.c.bf16 %v1974_v34, %v1972_v60  ;;  %2036 = vst [vmem:[%s3865_s7 + $0x1c8] sm:$0xff] %v1972_v60  ;;  %v1844_v19 = vsel %vm4504_vm6, %v4461_v37, %v1839_v21  ;;  %v5054_v63 = vld [vmem:[#allocation32_spill] sm:$0xff] }
 0x414   : > { %v1849_v43 = vadd.f32 %v4475_v42, %v1848_v58  ;;  %v1828_v58 = vand.u32 2147483648, %v4500_v7  ;;  %2038 = vst [vmem:[%s3865_s7 + $0x1d8] sm:$0xff] %v1974_v34  ;;  %v1784_v37 = vand.u32 2147483647, %v4502_v20  ;;  %vm4624_vm5 = vcmp.eq.f32.partialorder %v1826_v46, 8.507059e+37 }
 0x415   : > { %v4546_v51 = vpop.eup %2863  ;;  %2037 = vst [vmem:[%s3865_s7 + $0x1d0] sm:$0xff] %v1973_v53  ;;  %v2079_v32 = vpack.c.bf16 %v1973_v53, %v1971_v54  ;;  %v1807_v56 = vadd.f32 %v4484_v11, %v1806_v36  ;;  %2171 = vmatpush.bf16.xpose.msra.mxu1 %v2080_v49  ;;  %v5053_v54 = vld [vmem:[#allocation30_spill] sm:$0xff]  ;;  %v1968_v53 = vmul.f32 %v5054_v63, %v1844_v19 }
 0x416   : > { %v4559_v57 = vpop.eup %2865  ;;  %v1818_v17 = vmul.f32 %v4546_v51, %v4500_v7  ;;  %v4565_v40 = vpop.xlane.xlu1 %1441  ;;  %v1853_v48 = vsel %vm4581_vm15, %v4475_v42, %v1849_v43  ;;  %v1967_v10 = vmul.f32 %v5053_v54, %v1844_v19  ;;  %vm1823_vm2 = vweird.f32 %v4546_v51  ;;  %v589_v19 = vld [vmem:[#allocation14 + $0x78] sm:$0xff] }
 0x417   : > { %v1776_v35 = vmul.f32 %v4559_v57, %v4502_v20  ;;  %2867 = vrcp.f32 %v4565_v40  ;;  %2142 = vmatpush.bf16.xpose.msra.mxu0 %v2079_v32  ;;  %v1858_v42 = vsel %vm4522_vm9, %v1857_v26, %v1853_v48  ;;  %v1811_v44 = vsel %vm1810_vm1, %v4484_v11, %v1807_v56  ;;  %2032 = vst [vmem:[%s3865_s7 + $0x1a8] sm:$0xff] %v1968_v53  ;;  %vm4620_vm4 = vmor %vm1822_vm14, %vm1823_vm2 }
 0x418   : > { %v1819_v27 = vsub.f32 1.0, %v1818_v17  ;;  %v1969_v60 = vmul.f32 %v4136_v41, %v1858_v42  ;;  %2031 = vst [vmem:[%s3865_s7 + $0x1a0] sm:$0xff] %v1967_v10  ;;  %v1970_v5 = vmul.f32 %v4152_v61, %v1858_v42  ;;  %v1786_v43 = vand.u32 2147483648, %v4502_v20 }
 0x419   : > { %v1777_v36 = vsub.f32 1.0, %v1776_v35  ;;  %v1816_v30 = vsel %vm4529_vm10, %v1815_v18, %v1811_v44  ;;  %v1829_v62 = vor.u32 1.1754944e-38, %v1828_v58  ;;  %v586_v35 = vld [vmem:[#allocation14 + $0x60] sm:$0xff]  ;;  %vm1781_vm0 = vweird.f32 %v4559_v57 }
 0x41a   : > { %v1820_v39 = vmul.f32 %v4546_v51, %v1819_v27  ;;  %2033 = vst [vmem:[%s3865_s7 + $0x1b0] sm:$0xff] %v1969_v60  ;;  %v2077_v11 = vpack.c.bf16 %v1969_v60, %v1967_v10  ;;  %v2078_v21 = vpack.c.bf16 %v1970_v5, %v1968_v53  ;;  %v4630_v17 = vmul.f32 %v4119_v29, %v1816_v30  ;;  %vm1782_vm8 = vmor %vm1780_vm3, %vm1781_vm0 }
 0x41b   : > { %v1778_v33 = vmul.f32 %v4559_v57, %v1777_v36  ;;  %2034 = vst [vmem:[%s3865_s7 + $0x1b8] sm:$0xff] %v1970_v5  ;;  %v1964_v56 = vmul.f32 %v4127_v1, %v1816_v30  ;;  %vm4645_vm6 = vcmp.eq.f32.partialorder %v1784_v37, 8.507059e+37  ;;  %v1787_v46 = vor.u32 1.1754944e-38, %v1786_v43  ;;  %v588_v1 = vld [vmem:[#allocation14 + $0x70] sm:$0xff]  ;;  %v693_v36 = vpop.f32.mrf.mxu1 }
 0x41c   : > { %v1821_v34 = vadd.f32 %v4546_v51, %v1820_v39  ;;  %2027 = vst [vmem:[%s3865_s7 + $0x180] sm:$0xff] %v4630_v17  ;;  %vm1794_vm7 = vweird.f32 %v4565_v40  ;;  %v1800_v48 = vand.u32 2147483648, %v4565_v40  ;;  %v650_v10 = vadd.f32 %v4557_v2, %v586_v35 }
 0x41d   : > { %v4616_v26 = vpop.eup %2867  ;;  %v1779_v29 = vadd.f32 %v4559_v57, %v1778_v33  ;;  %2172 = vmatpush.bf16.xpose.msra.mxu1 %v2078_v21  ;;  %2028 = vst [vmem:[%s3865_s7 + $0x188] sm:$0xff] %v1964_v56  ;;  %v691_v63 = vadd.f32 %v4567_v3, %v587_v9  ;;  %v1798_v42 = vand.u32 2147483647, %v4565_v40  ;;  %v694_v3 = vadd.f32 %v693_v36, %v589_v19 }
 0x41e   : > { %v1790_v18 = vmul.f32 %v4616_v26, %v4565_v40  ;;  %v4635_v7 = vpop.xlane.xlu1 %1435  ;;  %v4637_v32 = vpop.xlane.xlu2 %1432  ;;  %v1825_v49 = vsel %vm4620_vm4, %v4546_v51, %v1821_v34  ;;  %vm1795_vm9 = vweird.f32 %v4616_v26  ;;  %v1801_v61 = vor.u32 1.1754944e-38, %v1800_v48 }
 0x41f   : > { %2869 = vrcp.f32 %v4635_v7  ;;  %2143 = vmatpush.bf16.xpose.msra.mxu0 %v2077_v11  ;;  %v652_v51 = vpop.f32.mrf.mxu0  ;;  %v1830_v54 = vsel %vm4624_vm5, %v1829_v62, %v1825_v49  ;;  %v1783_v2 = vsel %vm1782_vm8, %v4559_v57, %v1779_v29  ;;  %vm4679_vm10 = vmor %vm1794_vm7, %vm1795_vm9  ;;  %v4688_v30 = vpack.c.bf16 %v694_v3, %v691_v63 }
 0x420   : > { %v1791_v58 = vsub.f32 1.0, %v1790_v18  ;;  %2871 = vrcp.f32 %v4637_v32  ;;  %v1965_v39 = vmul.f32 %v4202_v12, %v1830_v54  ;;  %v1966_v37 = vmul.f32 %v4204_v47, %v1830_v54 }
 0x421   : > { %v653_v33 = vadd.f32 %v652_v51, %v588_v1  ;;  %v1788_v44 = vsel %vm4645_vm6, %v1787_v46, %v1783_v2  ;;  %vm1799_vm11 = vcmp.eq.f32.partialorder %v1798_v42, 8.507059e+37  ;;  %2135 = vmatmul.bf16.gmra.mxu1 %v4688_v30  ;;  %v1772_v35 = vand.u32 2147483648, %v4635_v7 }
 0x422   : > { %v1792_v53 = vmul.f32 %v4616_v26, %v1791_v58  ;;  %2029 = vst [vmem:[%s3865_s7 + $0x190] sm:$0xff] %v1965_v39  ;;  %v2075_v20 = vpack.c.bf16 %v1965_v39, %v4630_v17  ;;  %v2076_v5 = vpack.c.bf16 %v1966_v37, %v1964_v56  ;;  %v1959_v47 = vmul.f32 %v4209_v24, %v1788_v44 }
 0x423   : > { %2030 = vst [vmem:[%s3865_s7 + $0x198] sm:$0xff] %v1966_v37  ;;  %v1960_v57 = vmul.f32 %v4212_v38, %v1788_v44  ;;  %v4686_v43 = vpack.c.bf16 %v653_v33, %v650_v10  ;;  %v1770_v56 = vand.u32 2147483647, %v4635_v7  ;;  %v1758_v27 = vand.u32 2147483648, %v4637_v32 }
 0x424   : > { %v1793_v60 = vadd.f32 %v4616_v26, %v1792_v53  ;;  %2023 = vst [vmem:[%s3865_s7 + $0x160] sm:$0xff] %v1959_v47  ;;  %vm1766_vm13 = vweird.f32 %v4635_v7  ;;  %v1756_v1 = vand.u32 2147483647, %v4637_v32  ;;  %vm1752_vm2 = vweird.f32 %v4637_v32 }
 0x425   : > { %v4675_v34 = vpop.eup %2869  ;;  %2106 = vmatmul.bf16.gmra.mxu0 %v4686_v43  ;;  %2173 = vmatpush.bf16.xpose.msra.mxu1 %v2076_v5  ;;  %2024 = vst [vmem:[%s3865_s7 + $0x168] sm:$0xff] %v1960_v57  ;;  %vm4724_vm1 = vcmp.eq.f32.partialorder %v1770_v56, 8.507059e+37  ;;  %v1773_v10 = vor.u32 1.1754944e-38, %v1772_v35  ;;  %v1759_v63 = vor.u32 1.1754944e-38, %v1758_v27 }
 0x426   : > { %v2872_v41 = vpop.eup %2871  ;;  %v1762_v11 = vmul.f32 %v4675_v34, %v4635_v7  ;;  %v4692_v40 = vpop.xlane.xlu1 %1429  ;;  %v1797_v21 = vsel %vm4679_vm10, %v4616_v26, %v1793_v60  ;;  %vm1767_vm12 = vweird.f32 %v4675_v34  ;;  %vm1757_vm4 = vcmp.eq.f32.partialorder %v1756_v1, 8.507059e+37 }
 0x427   : > { %v1748_v24 = vmul.f32 %v2872_v41, %v4637_v32  ;;  %2873 = vrcp.f32 %v4692_v40  ;;  %2144 = vmatpush.bf16.xpose.msra.mxu0 %v2075_v20  ;;  %v1802_v17 = vsel %vm1799_vm11, %v1801_v61, %v1797_v21  ;;  %vm1753_vm14 = vweird.f32 %v2872_v41  ;;  %vm4717_vm15 = vmor %vm1766_vm13, %vm1767_vm12 }
 0x428   : > { %v1763_v38 = vsub.f32 1.0, %v1762_v11  ;;  %v1961_v26 = vmul.f32 %v4233_v0, %v1802_v17  ;;  %v1962_v18 = vmul.f32 %v4237_v15, %v1802_v17  ;;  %vm1754_vm3 = vmor %vm1752_vm2, %vm1753_vm14  ;;  %v1742_v39 = vand.u32 2147483647, %v4692_v40 }
 0x429   : > { %v1749_v62 = vsub.f32 1.0, %v1748_v24  ;;  %v1744_v32 = vand.u32 2147483648, %v4692_v40  ;;  %vm1738_vm0 = vweird.f32 %v4692_v40 }
 0x42a   : > { %v1764_v49 = vmul.f32 %v4675_v34, %v1763_v38  ;;  %2025 = vst [vmem:[%s3865_s7 + $0x170] sm:$0xff] %v1961_v26  ;;  %v2073_v46 = vpack.c.bf16 %v1961_v26, %v1959_v47  ;;  %v2074_v58 = vpack.c.bf16 %v1962_v18, %v1960_v57  ;;  %vm1743_vm7 = vcmp.eq.f32.partialorder %v1742_v39, 8.507059e+37 }
 0x42b   : > { %v1750_v9 = vmul.f32 %v2872_v41, %v1749_v62  ;;  %2026 = vst [vmem:[%s3865_s7 + $0x178] sm:$0xff] %v1962_v18  ;;  %v1745_v12 = vor.u32 1.1754944e-38, %v1744_v32 }
 0x42c   : > { %v1765_v29 = vadd.f32 %v4675_v34, %v1764_v49 }
 0x42d   : > { %v2874_v0 = vpop.eup %2873  ;;  %v1751_v15 = vadd.f32 %v2872_v41, %v1750_v9  ;;  %2174 = vmatpush.bf16.xpose.msra.mxu1 %v2074_v58 }
 0x42e   : > { %v1734_v19 = vmul.f32 %v2874_v0, %v4692_v40  ;;  %v4722_v36 = vpop.xlane.xlu1 %1423  ;;  %v1769_v54 = vsel %vm4717_vm15, %v4675_v34, %v1765_v29  ;;  %vm1739_vm5 = vweird.f32 %v2874_v0 }
 0x42f   : > { %2875 = vrcp.f32 %v4722_v36  ;;  %v4730_v7 = vpop.xlane.xlu2 %1426  ;;  %2145 = vmatpush.bf16.xpose.msra.mxu0 %v2073_v46  ;;  %v1755_v37 = vsel %vm1754_vm3, %v2872_v41, %v1751_v15  ;;  %v1774_v33 = vsel %vm4724_vm1, %v1773_v10, %v1769_v54  ;;  %vm1740_vm6 = vmor %vm1738_vm0, %vm1739_vm5  ;;  %v1716_v21 = vand.u32 2147483648, %v4722_v36 }
 0x430   : > { %v1735_v53 = vsub.f32 1.0, %v1734_v19  ;;  %2877 = vrcp.f32 %v4730_v7  ;;  %v1760_v2 = vsel %vm1757_vm4, %v1759_v63, %v1755_v37  ;;  %v1957_v60 = vmul.f32 %v4267_v45, %v1774_v33 }
 0x431   : > { %v1955_v3 = vmul.f32 %v4280_v13, %v1760_v2  ;;  %v1956_v20 = vmul.f32 %v4284_v28, %v1760_v2  ;;  %v1958_v44 = vmul.f32 %v4272_v8, %v1774_v33  ;;  %v2199_v28 = vld [vmem:[#allocation2] sm:$0x1]  ;;  %v1714_v26 = vand.u32 2147483647, %v4722_v36 }
 0x432   : > { %v1736_v42 = vmul.f32 %v2874_v0, %v1735_v53  ;;  %2021 = vst [vmem:[%s3865_s7 + $0x150] sm:$0xff] %v1957_v60  ;;  %v1730_v18 = vand.u32 2147483648, %v4730_v7  ;;  %v1728_v56 = vand.u32 2147483647, %v4730_v7  ;;  %vm1710_vm10 = vweird.f32 %v4722_v36 }
 0x433   : > { %2019 = vst [vmem:[%s3865_s7 + $0x140] sm:$0xff] %v1955_v3  ;;  %v2071_v47 = vpack.c.bf16 %v1957_v60, %v1955_v3  ;;  %v2072_v45 = vpack.c.bf16 %v1958_v44, %v1956_v20  ;;  %vm1724_vm12 = vweird.f32 %v4730_v7  ;;  %vm1715_vm13 = vcmp.eq.f32.partialorder %v1714_v26, 8.507059e+37  ;;  %v5067_v3 = vld [vmem:[#allocation36_spill] sm:$0xff] }
 0x434   : > { %v1737_v5 = vadd.f32 %v2874_v0, %v1736_v42  ;;  %2020 = vst [vmem:[%s3865_s7 + $0x148] sm:$0xff] %v1956_v20  ;;  %v1731_v27 = vor.u32 1.1754944e-38, %v1730_v18  ;;  %vm1729_vm15 = vcmp.eq.f32.partialorder %v1728_v56, 8.507059e+37  ;;  %v2887_v18 = vld [vmem:[%s3426_s26 + $0x40] sm:$0xff] }
 0x435   : > { %v2876_v34 = vpop.eup %2875  ;;  %2022 = vst [vmem:[%s3865_s7 + $0x158] sm:$0xff] %v1958_v44  ;;  %2175 = vmatpush.bf16.xpose.msra.mxu1 %v2072_v45 }
 0x436   : > { %v2878_v57 = vpop.eup %2877  ;;  %v1706_v13 = vmul.f32 %v2876_v34, %v4722_v36  ;;  %v1741_v41 = vsel %vm1740_vm6, %v2874_v0, %v1737_v5  ;;  %2568 = vpush %v2199_v28  ;;  %vm1711_vm8 = vweird.f32 %v2876_v34 }
 0x437   : > { %v1720_v61 = vmul.f32 %v2878_v57, %v4730_v7  ;;  %v1421_v11 = vpop.xlane.xlu2 %1420  ;;  %v1746_v40 = vsel %vm1743_vm7, %v1745_v12, %v1741_v41  ;;  %2146 = vmatpush.bf16.xpose.msra.mxu0 %v2071_v47  ;;  %vm1725_vm9 = vweird.f32 %v2878_v57  ;;  %vm1712_vm11 = vmor %vm1710_vm10, %vm1711_vm8  ;;  %v2884_v47 = vld [vmem:[%s3426_s26 + $0x10] sm:$0xff] }
 0x438   : > { %v1707_v8 = vsub.f32 1.0, %v1706_v13  ;;  %2879 = vrcp.f32 %v1421_v11  ;;  %v1953_v38 = vmul.f32 %v4314_v59, %v1746_v40  ;;  %v1954_v17 = vmul.f32 %v4317_v55, %v1746_v40  ;;  %vm1726_vm14 = vmor %vm1724_vm12, %vm1725_vm9 }
 0x439   : > { %v1721_v24 = vsub.f32 1.0, %v1720_v61  ;;  %v1717_v59 = vor.u32 1.1754944e-38, %v1716_v21  ;;  %v1700_v7 = vand.u32 2147483647, %v1421_v11  ;;  %v1702_v54 = vand.u32 2147483648, %v1421_v11  ;;  %v2885_v61 = vld [vmem:[%s3426_s26 + $0x20] sm:$0xff] }
 0x43a   : > { %v1708_v62 = vmul.f32 %v2876_v34, %v1707_v8  ;;  %2017 = vst [vmem:[%s3865_s7 + $0x130] sm:$0xff] %v1953_v38  ;;  %vm1696_vm2 = vweird.f32 %v1421_v11 }
 0x43b   : > { %v1722_v49 = vmul.f32 %v2878_v57, %v1721_v24  ;;  %2018 = vst [vmem:[%s3865_s7 + $0x138] sm:$0xff] %v1954_v17  ;;  %vm1701_vm4 = vcmp.eq.f32.partialorder %v1700_v7, 8.507059e+37 }
 0x43c   : > { %v1709_v35 = vadd.f32 %v2876_v34, %v1708_v62 }
 0x43d   : > { %v1723_v9 = vadd.f32 %v2878_v57, %v1722_v49 }
 0x43e   : > { %v2880_v55 = vpop.eup %2879  ;;  %v1713_v29 = vsel %vm1712_vm11, %v2876_v34, %v1709_v35 }
 0x43f   : > { %v1692_v46 = vmul.f32 %v2880_v55, %v1421_v11  ;;  %v1727_v58 = vsel %vm1726_vm14, %v2878_v57, %v1723_v9  ;;  %v1718_v0 = vsel %vm1715_vm13, %v1717_v59, %v1713_v29  ;;  %vm1697_vm1 = vweird.f32 %v2880_v55 }
 0x440   : > { %v1732_v15 = vsel %vm1729_vm15, %v1731_v27, %v1727_v58  ;;  %v1949_v1 = vmul.f32 %v4335_v50, %v1718_v0  ;;  %v1950_v48 = vmul.f32 %v4337_v6, %v1718_v0  ;;  %vm1698_vm3 = vmor %vm1696_vm2, %vm1697_vm1 }
 0x441   : > { %v1693_v51 = vsub.f32 1.0, %v1692_v46  ;;  %v1951_v19 = vmul.f32 %v4340_v4, %v1732_v15  ;;  %v1952_v36 = vmul.f32 %v4349_v23, %v1732_v15  ;;  %v1703_v4 = vor.u32 1.1754944e-38, %v1702_v54 }
 0x442   : > { %2013 = vst [vmem:[%s3865_s7 + $0x110] sm:$0xff] %v1949_v1 }
 0x443   : > { %v1694_v10 = vmul.f32 %v2880_v55, %v1693_v51  ;;  %2015 = vst [vmem:[%s3865_s7 + $0x120] sm:$0xff] %v1951_v19  ;;  %v2069_v63 = vpack.c.bf16 %v1953_v38, %v1951_v19  ;;  %v2070_v53 = vpack.c.bf16 %v1954_v17, %v1952_v36  ;;  %v2886_v38 = vld [vmem:[%s3426_s26 + $0x30] sm:$0xff] }
 0x444   : > { %2016 = vst [vmem:[%s3865_s7 + $0x128] sm:$0xff] %v1952_v36 }
 0x445   : > { %v1695_v50 = vadd.f32 %v2880_v55, %v1694_v10  ;;  %2147 = vmatpush.bf16.xpose.msra.mxu0 %v2069_v63  ;;  %2176 = vmatpush.bf16.xpose.msra.mxu1 %v2070_v53  ;;  %2014 = vst [vmem:[%s3865_s7 + $0x118] sm:$0xff] %v1950_v48 }
 0x447   : > { %v1699_v23 = vsel %vm1698_vm3, %v2880_v55, %v1695_v50 }
 0x448   : > { %v1704_v6 = vsel %vm1701_vm4, %v1703_v4, %v1699_v23 }
 0x449   : > { %v1947_v39 = vmul.f32 %v4353_v25, %v1704_v6  ;;  %v1948_v32 = vmul.f32 %v4355_v31, %v1704_v6  ;;  %v5068_v25 = vld [vmem:[#allocation37_spill] sm:$0xff] }
 0x44b   : > { %2011 = vst [vmem:[%s3865_s7 + $0x100] sm:$0xff] %v1947_v39  ;;  %v2067_v37 = vpack.c.bf16 %v1949_v1, %v1947_v39  ;;  %v2068_v42 = vpack.c.bf16 %v1950_v48, %v1948_v32 }
 0x44c   : > { %2012 = vst [vmem:[%s3865_s7 + $0x108] sm:$0xff] %v1948_v32  ;;  %s3129_s7 = scalar_lea.hbm %s4900_s9, 1024 }
 0x44d   : > { %2148 = vmatpush.bf16.xpose.msra.mxu0 %v2067_v37  ;;  %2177 = vmatpush.bf16.xpose.msra.mxu1 %v2068_v42  ;;  %p3131_p7 = scmp.lt.s32.totalorder %s3129_s7, %s3125_s2 }
 0x44f   : > { %p3132_p8 = por %p3131_p7, %p3130_p12 }
 0x451   : > { %p3133_p9 = pnand %p3132_p8, %p3128_p4 }
 0x454   : > { %2149 = vmatmul.bf16.vlgmr.msra.gmra.mxu0 %v4363_v22  ;;  %2178 = vmatmul.bf16.vlgmr.msra.gmra.mxu1 %v4365_v52  ;;  %v2883_v52 = vld [vmem:[%s3426_s26] sm:$0xff] }
 0x45b   : > { %v2092_v2 = vpop.f32.mrf.mxu0  ;;  %v2121_v33 = vpop.f32.mrf.mxu1 }
 0x45c   : > { %v2122_v31 = vadd.f32 %v2121_v33, %v2092_v2 }
 0x463   : > { %v2094_v60 = vpop.f32.mrf.mxu0  ;;  %v2123_v20 = vpop.f32.mrf.mxu1 }
 0x464   : > { %2154 = vmatmul.bf16.gmra.mxu0 %v5067_v3  ;;  %2183 = vmatmul.bf16.gmra.mxu1 %v5068_v25  ;;  %v2124_v44 = vadd.f32 %v2123_v20, %v2094_v60 }
 0x467   : > { %s2569_s15 = spop %2568 }
 0x468   : > { %v4777_v5 = vstv %s2569_s15 }
 0x469   : > { %v2202_v22 = vmul.f32 %v4777_v5, %v2122_v31  ;;  %v2204_v34 = vmul.f32 %v4777_v5, %v2124_v44 }
 0x46b   : > { %v2218_v12 = vadd.f32 %v2883_v52, %v2202_v22  ;;  %v2220_v57 = vadd.f32 %v2884_v47, %v2204_v34 }
 0x46d   : > { %2234 = vst [vmem:[%s4785_s28] sm:$0xff] %v2218_v12  ;;  %v2097_v13 = vpop.f32.mrf.mxu0  ;;  %v2126_v45 = vpop.f32.mrf.mxu1 }
 0x46e   : > { %2236 = vst [vmem:[%s4785_s28 + $0x10] sm:$0xff] %v2220_v57  ;;  %v2127_v41 = vadd.f32 %v2126_v45, %v2097_v13 }
 0x470   : > { %v2206_v28 = vmul.f32 %v4777_v5, %v2127_v41 }
 0x472   : > { %v2222_v11 = vadd.f32 %v2885_v61, %v2206_v28 }
 0x474   : > { %2159 = vmatmul.bf16.gmra.mxu0 %v4553_v14  ;;  %2188 = vmatmul.bf16.gmra.mxu1 %v4555_v16  ;;  %2238 = vst [vmem:[%s4785_s28 + $0x20] sm:$0xff] %v2222_v11 }
 0x475   : > { %v2099_v40 = vpop.f32.mrf.mxu0  ;;  %v2128_v8 = vpop.f32.mrf.mxu1 }
 0x476   : > { %v2129_v21 = vadd.f32 %v2128_v8, %v2099_v40 }
 0x478   : > { %v2208_v24 = vmul.f32 %v4777_v5, %v2129_v21 }
 0x47a   : > { %v2224_v14 = vadd.f32 %v2886_v38, %v2208_v24 }
 0x47c   : > { %2240 = vst [vmem:[%s4785_s28 + $0x30] sm:$0xff] %v2224_v14 }
 0x484   : > { %2164 = vmatmul.bf16.gmra.mxu0 %v4686_v43  ;;  %2193 = vmatmul.bf16.gmra.mxu1 %v4688_v30 }
 0x48d   : > { %v2102_v16 = vpop.f32.mrf.mxu0 }
 0x48e   : > { %v2131_v17 = vpop.f32.mrf.mxu1 }
 0x48f   : > { %v2132_v62 = vadd.f32 %v2131_v17, %v2102_v16 }
 0x491   : > { %v2210_v26 = vmul.f32 %v4777_v5, %v2132_v62 }
 0x493   : > { %v2226_v49 = vadd.f32 %v2887_v18, %v2210_v26 }
 0x494   : > { %3136 = shalt.err (!%p3133_p9)
}
 0x495   : > { %s3231_s29 = smov 256   ;;  %s3232_s30 = smov 16   ;;  %2242 = vst [vmem:[%s4785_s28 + $0x40] sm:$0xff] %v2226_v49  ;;  %v2104_v43 = vpop.f32.mrf.mxu0  ;;  %v2888_v59 = vld [vmem:[%s3426_s26 + $0x50] sm:$0xff]  ;;  %v2889_v58 = vld [vmem:[%s3426_s26 + $0x60] sm:$0xff]  ;;  %v2891_v53 = vld [vmem:[%s3426_s26 + $0x8] sm:$0xff] }
 0x496   : > { %2597 = dma.vmem_to_hbm [thread:$0]  (%p3386_p5), %s2286_s19, 8192, %s2288_s24, %s2256_s16, %s3231_s29, %s3231_s29, %s3232_s30   ;;  %v2133_v30 = vpop.f32.mrf.mxu1 }
 0x497   : > { %v2134_v56 = vadd.f32 %v2133_v30, %v2104_v43  ;;  %v2890_v36 = vld [vmem:[%s3426_s26 + $0x70] sm:$0xff]  ;;  %v2892_v32 = vld [vmem:[%s3426_s26 + $0x18] sm:$0xff]  ;;  %v2893_v25 = vld [vmem:[%s3426_s26 + $0x28] sm:$0xff]  ;;  %s2566_s19 = sshll.u32 %s3310_s17, 7  ;;  %s2268_s10 = sshll.u32 %s4785_s28, 4  ;;  %s2269_s10 = int_to_ptr.vmem [resolvable:$true] %s2268_s10 }
 0x498   : > { %v2894_v34 = vld [vmem:[%s3426_s26 + $0x38] sm:$0xff]  ;;  %v2895_v45 = vld [vmem:[%s3426_s26 + $0x48] sm:$0xff]  ;;  %s2267_s16 = scalar_lea.hbm %s4899_s8, %s2566_s19  ;;  %s2251_s17 = scalar_lea.sflag [#allocation5], %s3420_s22 }
 0x499   : > { %v2212_v35 = vmul.f32 %v4777_v5, %v2134_v56  ;;  %v2896_v8 = vld [vmem:[%s3426_s26 + $0x58] sm:$0xff]  ;;  %v2897_v17 = vld [vmem:[%s3426_s26 + $0x68] sm:$0xff]  ;;  %s2270_s2 = sshll.u32 %s2267_s16, 4  ;;  %s3157_s25 = scalar_lea.hbm %s4899_s8, 256  ;;  %s2271_s2 = int_to_ptr.hbm [resolvable:$true] %s2270_s2 }
 0x49a   : > { %v2898_v30 = vld [vmem:[%s3426_s26 + $0x78] sm:$0xff]  ;;  %s3151_s3 = sshra.s32 %s2271_s2, 4  ;;  %s3152_s3 = int_to_ptr.hbm [resolvable:$true] %s3151_s3 }
 0x49b   : > { %v2228_v9 = vadd.f32 %v2888_v59, %v2212_v35  ;;  %s3153_s18 = scalar_lea.hbm %s3152_s3, 128  ;;  %p3158_p0 = scmp.lt.s32.totalorder %s3152_s3, %s4899_s8 }
 0x49c   : > { %p3154_p10 = scmp.ne.s32.totalorder %s3152_s3, %s3153_s18  ;;  %p3159_p2 = scmp.lt.s32.totalorder %s3157_s25, %s3153_s18 }
 0x49d   : > { %2244 = vst [vmem:[%s4785_s28 + $0x50] sm:$0xff] %v2228_v9 }
 0x49e   : > { %v2136_v29 = vpop.f32.mrf.mxu1  ;;  %p3155_p13 = pnand %p3154_p10, %p3386_p5  ;;  %p3160_p1 = por %p3159_p2, %p3158_p0 }
 0x4a0   : > { %p3156_p11 = pneg %p3155_p13 }
 0x4a2   : > { %v2107_v55 = vpop.f32.mrf.mxu0  ;;  %p3161_p3 = pnand %p3160_p1, %p3156_p11 }
 0x4a3   : > { %v2137_v27 = vadd.f32 %v2136_v29, %v2107_v55 }
 0x4a5   : > { %v2214_v46 = vmul.f32 %v4777_v5, %v2137_v27 }
 0x4a6   : > { %v2138_v1 = vpop.f32.mrf.mxu1 }
 0x4a7   : > { %v2230_v0 = vadd.f32 %v2889_v58, %v2214_v46 }
 0x4a9   : > { %2246 = vst [vmem:[%s4785_s28 + $0x60] sm:$0xff] %v2230_v0 }
 0x4aa   : > { %v2109_v15 = vpop.f32.mrf.mxu0 }
 0x4ab   : > { %v2139_v51 = vadd.f32 %v2138_v1, %v2109_v15 }
 0x4ad   : > { %v2216_v19 = vmul.f32 %v4777_v5, %v2139_v51 }
 0x4af   : > { %v2232_v48 = vadd.f32 %v2890_v36, %v2216_v19 }
 0x4b1   : > { %2248 = vst [vmem:[%s4785_s28 + $0x70] sm:$0xff] %v2232_v48 }
 0x4d1   : > { %v2150_v7 = vpop.f32.mrf.mxu0  ;;  %v2179_v54 = vpop.f32.mrf.mxu1 }
 0x4d2   : > { %v2180_v10 = vadd.f32 %v2179_v54, %v2150_v7 }
 0x4d4   : > { %v2203_v63 = vmul.f32 %v4777_v5, %v2180_v10 }
 0x4d6   : > { %v2219_v50 = vadd.f32 %v2891_v53, %v2203_v63 }
 0x4d8   : > { %2235 = vst [vmem:[%s4785_s28 + $0x8] sm:$0xff] %v2219_v50 }
 0x4d9   : > { %v2152_v4 = vpop.f32.mrf.mxu0  ;;  %v2181_v23 = vpop.f32.mrf.mxu1 }
 0x4da   : > { %v2182_v6 = vadd.f32 %v2181_v23, %v2152_v4 }
 0x4dc   : > { %v2205_v39 = vmul.f32 %v4777_v5, %v2182_v6 }
 0x4de   : > { %v2221_v37 = vadd.f32 %v2892_v32, %v2205_v39 }
 0x4e0   : > { %2237 = vst [vmem:[%s4785_s28 + $0x18] sm:$0xff] %v2221_v37 }
 0x4e1   : > { %v2155_v42 = vpop.f32.mrf.mxu0  ;;  %v2184_v2 = vpop.f32.mrf.mxu1 }
 0x4e2   : > { %v2185_v33 = vadd.f32 %v2184_v2, %v2155_v42 }
 0x4e4   : > { %v2207_v3 = vmul.f32 %v4777_v5, %v2185_v33 }
 0x4e6   : > { %v2223_v31 = vadd.f32 %v2893_v25, %v2207_v3 }
 0x4e8   : > { %2239 = vst [vmem:[%s4785_s28 + $0x28] sm:$0xff] %v2223_v31 }
 0x4e9   : > { %v2157_v60 = vpop.f32.mrf.mxu0  ;;  %v2186_v20 = vpop.f32.mrf.mxu1 }
 0x4ea   : > { %v2187_v44 = vadd.f32 %v2186_v20, %v2157_v60 }
 0x4ec   : > { %v2209_v22 = vmul.f32 %v4777_v5, %v2187_v44 }
 0x4ee   : > { %v2225_v52 = vadd.f32 %v2894_v34, %v2209_v22 }
 0x4f0   : > { %2241 = vst [vmem:[%s4785_s28 + $0x38] sm:$0xff] %v2225_v52 }
 0x4f1   : > { %v2160_v12 = vpop.f32.mrf.mxu0  ;;  %v2189_v47 = vpop.f32.mrf.mxu1 }
 0x4f2   : > { %v2190_v57 = vadd.f32 %v2189_v47, %v2160_v12 }
 0x4f4   : > { %v2211_v13 = vmul.f32 %v4777_v5, %v2190_v57 }
 0x4f6   : > { %v2227_v41 = vadd.f32 %v2895_v45, %v2211_v13 }
 0x4f8   : > { %2243 = vst [vmem:[%s4785_s28 + $0x48] sm:$0xff] %v2227_v41 }
 0x4f9   : > { %v2162_v28 = vpop.f32.mrf.mxu0  ;;  %v2191_v61 = vpop.f32.mrf.mxu1 }
 0x4fa   : > { %v2192_v11 = vadd.f32 %v2191_v61, %v2162_v28 }
 0x4fc   : > { %v2213_v40 = vmul.f32 %v4777_v5, %v2192_v11 }
 0x4fe   : > { %v2229_v21 = vadd.f32 %v2896_v8, %v2213_v40 }
 0x500   : > { %2245 = vst [vmem:[%s4785_s28 + $0x58] sm:$0xff] %v2229_v21 }
 0x501   : > { %v2165_v24 = vpop.f32.mrf.mxu0  ;;  %v2194_v38 = vpop.f32.mrf.mxu1 }
 0x502   : > { %v2195_v14 = vadd.f32 %v2194_v38, %v2165_v24 }
 0x504   : > { %v2215_v16 = vmul.f32 %v4777_v5, %v2195_v14 }
 0x506   : > { %v2231_v62 = vadd.f32 %v2897_v17, %v2215_v16 }
 0x508   : > { %2247 = vst [vmem:[%s4785_s28 + $0x68] sm:$0xff] %v2231_v62 }
 0x509   : > { %v2167_v26 = vpop.f32.mrf.mxu0  ;;  %v2196_v18 = vpop.f32.mrf.mxu1 }
 0x50a   : > { %v2197_v49 = vadd.f32 %v2196_v18, %v2167_v26 }
 0x50c   : > { %v2217_v43 = vmul.f32 %v4777_v5, %v2197_v49 }
 0x50e   : > { %v2233_v56 = vadd.f32 %v2898_v30, %v2217_v43 }
 0x510   : > { %2249 = vst [vmem:[%s4785_s28 + $0x78] sm:$0xff] %v2233_v56 }
 0x511   : > { %3164 = shalt.err (!%p3161_p3)
}
 0x512   : > { %2596 = dma.vmem_to_hbm [thread:$0]  (%p3386_p5), %s2269_s10, 2048, %s2271_s2, %s2251_s17, %s3231_s29, %s3231_s29, %s3232_s30  }
 0x513 PF: > { %s2302_s22 = sand.u32 1, %s3207_s11   ;;  %p5069_p4 = scmp.ge.s32.totalorder %s3219_s14, 2 }
 0x514   : > { %s2303_s26 = scalar_lea.sflag [#allocation5], %s2302_s22 }
 0x515   : > { %p2624_p12 = pnand %p5069_p4, %p3390_p6 }
 0x517   : > { %p2625_p7 = pneg %p2624_p12 }
 0x519   : > { %3198 = dma.done.wait (%p2625_p7), %s2303_s26, 2048  }
 0x51a   : > { %3200 = vsyncadd (%p2625_p7), %s2303_s26, 4294965248  ;;  %s2313_s28 = scalar_lea.sflag [#allocation17], %s2302_s22 }
 0x51b   : > { %3202 = dma.done.wait (%p2625_p7), %s2313_s28, 8192  }
 0x51c   : > { %3204 = vsyncadd (%p2625_p7), %s2313_s28, 4294959104  ;;  %p31_p5 = scmp.ge.s32.totalorder %s3360_s21, 4   ;;  %s5070_s11 = smov %s3211_s12 }
 0x51d   : > { %s5071_s12 = smov %s3215_s13  ;;  %s5072_s13 = smov %s3371_s27 }
 0x51e   : > { %s5073_s14 = smov %s3360_s21  ;;  %33 = sbr.rel (!%p31_p5) target bundleno = 14 (0xe), region = 138 }
 0x523   :  { %2319 = vsyncpa [#allocation4], 1 }
 0x524   :  { %2321 = vsyncpa [#allocation4 + $0x1], 1 }
 0x525   :  { %2322 = vsyncpa [#allocation7], 1 }
 0x526   :  { %2323 = vsyncpa [#allocation10], 1 }
 0x527   :  { %2324 = vsyncpa [#allocation13], 1 }
 0x528   :  { %2325 = vsyncpa [#allocation5], 1 }
 0x529   :  { %2327 = vsyncpa [#allocation5 + $0x1], 1 }
 0x52a   :  { %2328 = vsyncpa [#allocation17], 1 }
 0x52b   :  { %2330 = vsyncpa [#allocation17 + $0x1], 1 }

</bundles_post_ra>
